<compile_context>
chip_gen: v6e
topology: v6e:2x2x1
jax: 0.10.0
libtpu: 0.0.40
codegen_flags: <defaults>
</compile_context>

<pallas_src>
import functools
import math

import jax
import jax.numpy as jnp
from jax.experimental import pallas as pl
from jax.experimental.pallas import tpu as pltpu

ACT_DTYPE = jnp.bfloat16   # storage + MXU operand dtype for activations/weights
LN_EPS = 1e-5

_BUDGET = None


def _budget():
    """Per-generation VMEM limit and tile targets.

    v5e / v6e have 128 MiB physical VMEM -> big tiles, 96 MiB scoped limit.
    v7x has 64 MiB -> conservative tiles, 40 MiB limit (also the fallback)."""
    global _BUDGET
    if _BUDGET is None:
        try:
            vmem_cap = int(pltpu.get_tpu_info().vmem_capacity_bytes)
        except Exception:
            vmem_cap = 64 * 1024 * 1024
        if vmem_cap >= 100 * 1024 * 1024:          # v5e / v6e
            _BUDGET = dict(vmem_limit=96 * 2**20, tm=512, tn=1024, tk=1024,
                           attn_tq=512, attn_tk=512)
        else:                                      # v7x or unknown
            _BUDGET = dict(vmem_limit=40 * 2**20, tm=256, tn=512, tk=256,
                           attn_tq=256, attn_tk=512)
    return _BUDGET


def _pick_tile(dim, target, align):
    """Largest `align`-multiple divisor of `dim` that is <= target, else full dim."""
    if dim <= target:
        return dim
    t = (target // align) * align
    while t >= align:
        if dim % t == 0:
            return t
        t -= align
    return dim


# ----------------------------------------------------------------------------
# Tiled matmul (+ bias, optional ReLU).  bf16 operands, f32 accumulator.
# ----------------------------------------------------------------------------
def _matmul_kernel(x_ref, w_ref, b_ref, o_ref, acc_ref, *, relu):
    @pl.when(pl.program_id(2) == 0)
    def _():
        acc_ref[...] = jnp.zeros_like(acc_ref)

    acc_ref[...] += jnp.dot(x_ref[...], w_ref[...],
                            preferred_element_type=jnp.float32)

    @pl.when(pl.program_id(2) == pl.num_programs(2) - 1)
    def _():
        y = acc_ref[...] + b_ref[...]          # bias kept in f32
        if relu:
            y = jnp.maximum(y, 0.0)
        o_ref[...] = y.astype(o_ref.dtype)


def matmul(x, w_t, b, relu=False, out_dtype=None):
    """x: (M, K) bf16, w_t: (K, N) bf16 (pre-transposed), b: (N,) f32 -> (M, N)."""
    M, K = x.shape
    N = w_t.shape[1]
    cfg = _budget()
    tm = _pick_tile(M, cfg["tm"], 16)          # 16-row sublane packing for bf16
    tn = _pick_tile(N, cfg["tn"], 128)
    tk = _pick_tile(K, cfg["tk"], 128)
    out_dtype = ACT_DTYPE if out_dtype is None else out_dtype
    return pl.pallas_call(
        functools.partial(_matmul_kernel, relu=relu),
        out_shape=jax.ShapeDtypeStruct((M, N), out_dtype),
        grid_spec=pltpu.PrefetchScalarGridSpec(
            num_scalar_prefetch=0,
            grid=(M // tm, N // tn, K // tk),
            in_specs=[
                pl.BlockSpec((tm, tk), lambda i, j, k: (i, k)),
                pl.BlockSpec((tk, tn), lambda i, j, k: (k, j)),
                pl.BlockSpec((1, tn), lambda i, j, k: (0, j)),
            ],
            out_specs=pl.BlockSpec((tm, tn), lambda i, j, k: (i, j)),
            scratch_shapes=[pltpu.VMEM((tm, tn), jnp.float32)],
        ),
        compiler_params=pltpu.CompilerParams(
            dimension_semantics=("parallel", "parallel", "arbitrary"),
            vmem_limit_bytes=cfg["vmem_limit"],
        ),
    )(x, w_t, b.reshape(1, N).astype(jnp.float32))


# ----------------------------------------------------------------------------
# Tiled matmul with fused (bias + residual-add + LayerNorm) epilogue (f32 math).
# N (= d_model) is kept whole per block so LayerNorm sees full rows.
# ----------------------------------------------------------------------------
def _matmul_add_ln_kernel(x_ref, w_ref, b_ref, res_ref, g_ref, bt_ref,
                          o_ref, acc_ref, *, eps):
    @pl.when(pl.program_id(1) == 0)
    def _():
        acc_ref[...] = jnp.zeros_like(acc_ref)

    acc_ref[...] += jnp.dot(x_ref[...], w_ref[...],
                            preferred_element_type=jnp.float32)

    @pl.when(pl.program_id(1) == pl.num_programs(1) - 1)
    def _():
        z = acc_ref[...] + b_ref[...] + res_ref[...].astype(jnp.float32)
        mean = jnp.mean(z, axis=-1, keepdims=True)
        zc = z - mean
        var = jnp.mean(zc * zc, axis=-1, keepdims=True)
        inv = jax.lax.rsqrt(var + eps)
        y = zc * inv * g_ref[...] + bt_ref[...]
        o_ref[...] = y.astype(o_ref.dtype)


def matmul_add_layernorm(x, w_t, b, residual, gamma, beta,
                         eps=LN_EPS, out_dtype=None):
    """LayerNorm(residual + x @ w_t + b) * gamma + beta, fully fused."""
    M, K = x.shape
    N = w_t.shape[1]
    cfg = _budget()
    tm = _pick_tile(M, cfg["tm"], 16)
    tk = _pick_tile(K, cfg["tk"], 128)
    out_dtype = ACT_DTYPE if out_dtype is None else out_dtype
    f32 = jnp.float32
    return pl.pallas_call(
        functools.partial(_matmul_add_ln_kernel, eps=eps),
        out_shape=jax.ShapeDtypeStruct((M, N), out_dtype),
        grid_spec=pltpu.PrefetchScalarGridSpec(
            num_scalar_prefetch=0,
            grid=(M // tm, K // tk),
            in_specs=[
                pl.BlockSpec((tm, tk), lambda i, k: (i, k)),
                pl.BlockSpec((tk, N), lambda i, k: (k, 0)),
                pl.BlockSpec((1, N), lambda i, k: (0, 0)),
                pl.BlockSpec((tm, N), lambda i, k: (i, 0)),
                pl.BlockSpec((1, N), lambda i, k: (0, 0)),
                pl.BlockSpec((1, N), lambda i, k: (0, 0)),
            ],
            out_specs=pl.BlockSpec((tm, N), lambda i, k: (i, 0)),
            scratch_shapes=[pltpu.VMEM((tm, N), jnp.float32)],
        ),
        compiler_params=pltpu.CompilerParams(
            dimension_semantics=("parallel", "arbitrary"),
            vmem_limit_bytes=cfg["vmem_limit"],
        ),
    )(x, w_t, b.reshape(1, N).astype(f32), residual,
      gamma.reshape(1, N).astype(f32), beta.reshape(1, N).astype(f32))


# ----------------------------------------------------------------------------
# Flash attention over lane-dense batch-major slabs.
#   q:  (B, Lq, D)   bf16 (1/sqrt(Dh) already folded into the Q projection)
#   kv: (B, Lk, 2D)  bf16 (K in columns [:D], V in columns [D:])
# Grid = (B, Lq tiles, Lk tiles); Lk axis is "arbitrary" with m/l/acc scratch.
# Heads are split inside the kernel with static lane slices; output is written
# as one lane-dense (Lq, D) slab per (batch, q-tile).
# ----------------------------------------------------------------------------
def _attn_kernel(q_ref, kv_ref, o_ref, m_sc, l_sc, acc_sc, *, nhead, d_head):
    D = nhead * d_head
    ki = pl.program_id(2)

    @pl.when(ki == 0)
    def _():
        m_sc[...] = jnp.full_like(m_sc, -jnp.inf)
        l_sc[...] = jnp.zeros_like(l_sc)
        acc_sc[...] = jnp.zeros_like(acc_sc)

    q = q_ref[0]      # (Tq, D)  bf16
    kv = kv_ref[0]    # (Tk, 2D) bf16

    for h in range(nhead):                                   # static unroll
        qh = q[:, h * d_head:(h + 1) * d_head]               # (Tq, Dh)
        kh = kv[:, h * d_head:(h + 1) * d_head]              # (Tk, Dh)
        vh = kv[:, D + h * d_head:D + (h + 1) * d_head]      # (Tk, Dh)
        s = jax.lax.dot_general(qh, kh, (((1,), (1,)), ((), ())),
                                preferred_element_type=jnp.float32)   # (Tq, Tk)
        m_prev = m_sc[h]                                      # (Tq, 1)
        m_new = jnp.maximum(m_prev, jnp.max(s, axis=-1, keepdims=True))
        alpha = jnp.exp(m_prev - m_new)
        p = jnp.exp(s - m_new)
        l_sc[h] = alpha * l_sc[h] + jnp.sum(p, axis=-1, keepdims=True)
        acc_sc[h] = alpha * acc_sc[h] + jnp.dot(
            p.astype(kv.dtype), vh, preferred_element_type=jnp.float32)
        m_sc[h] = m_new

    @pl.when(ki == pl.num_programs(2) - 1)
    def _():
        outs = []
        for h in range(nhead):
            inv = pl.reciprocal(l_sc[h], approx=True)         # EUP, ~free
            outs.append(acc_sc[h] * inv)
        o_ref[0] = jnp.concatenate(outs, axis=-1).astype(o_ref.dtype)


def attention(q, kv, nhead):
    """q: (B, Lq, D), kv: (B, Lk, 2D) -> (B, Lq, D), all bf16."""
    B, Lq, D = q.shape
    Lk = kv.shape[1]
    d_head = D // nhead
    cfg = _budget()
    tq = _pick_tile(Lq, cfg["attn_tq"], 16)
    tk = _pick_tile(Lk, cfg["attn_tk"], 16)
    return pl.pallas_call(
        functools.partial(_attn_kernel, nhead=nhead, d_head=d_head),
        out_shape=jax.ShapeDtypeStruct((B, Lq, D), q.dtype),
        grid_spec=pltpu.PrefetchScalarGridSpec(
            num_scalar_prefetch=0,
            grid=(B, Lq // tq, Lk // tk),
            in_specs=[
                pl.BlockSpec((1, tq, D), lambda b, qi, ki: (b, qi, 0)),
                pl.BlockSpec((1, tk, 2 * D), lambda b, qi, ki: (b, ki, 0)),
            ],
            out_specs=pl.BlockSpec((1, tq, D), lambda b, qi, ki: (b, qi, 0)),
            scratch_shapes=[
                pltpu.VMEM((nhead, tq, 1), jnp.float32),       # running max
                pltpu.VMEM((nhead, tq, 1), jnp.float32),       # running sum
                pltpu.VMEM((nhead, tq, d_head), jnp.float32),  # accumulator
            ],
        ),
        compiler_params=pltpu.CompilerParams(
            dimension_semantics=("parallel", "parallel", "arbitrary"),
            vmem_limit_bytes=cfg["vmem_limit"],
        ),
    )(q, kv)


# ----------------------------------------------------------------------------
# One-time parameter preparation: pre-transpose weights, split Q / fused-KV,
# fold 1/sqrt(Dh) into the Q projection, cast matmul weights to bf16
# (biases and LayerNorm params stay f32 for the f32 epilogues).
# ----------------------------------------------------------------------------
def prepare_params(params, d_model, nhead):
    D = d_model
    scale = 1.0 / math.sqrt(D // nhead)
    bf = ACT_DTYPE
    f32 = jnp.float32

    def prep_mha(p):
        w, b = p["in_proj_weight"], p["in_proj_bias"]
        return {
            "w_q_t": (w[:D] * scale).T.astype(bf), "b_q": (b[:D] * scale).astype(f32),
            "w_kv_t": w[D:].T.astype(bf),          "b_kv": b[D:].astype(f32),
            "w_out_t": p["out_proj_weight"].T.astype(bf),
            "b_out": p["out_proj_bias"].astype(f32),
        }

    return {
        "self_attn": prep_mha(params["self_attn"]),
        "cross_attn": prep_mha(params["cross_attn"]),
        "linear1_w_t": params["linear1_w"].T.astype(bf),
        "linear1_b": params["linear1_b"].astype(f32),
        "linear2_w_t": params["linear2_w"].T.astype(bf),
        "linear2_b": params["linear2_b"].astype(f32),
        "norm1_w": params["norm1_w"].astype(f32), "norm1_b": params["norm1_b"].astype(f32),
        "norm2_w": params["norm2_w"].astype(f32), "norm2_b": params["norm2_b"].astype(f32),
        "norm3_w": params["norm3_w"].astype(f32), "norm3_b": params["norm3_b"].astype(f32),
    }


# ----------------------------------------------------------------------------
# DecoderLayer forward (Pallas)
# ----------------------------------------------------------------------------
def decoder_layer_forward(tgt, memory, prep, nhead):
    """tgt: (Lt, B, D), memory: (Lm, B, D) -> (Lt, B, D) float32."""
    Lt, B, D = tgt.shape
    Lm = memory.shape[0]

    # Single entry layout change: seq-major -> batch-major, bf16 storage.
    xb = jnp.transpose(tgt, (1, 0, 2)).astype(ACT_DTYPE)       # (B, Lt, D)
    mb = jnp.transpose(memory, (1, 0, 2)).astype(ACT_DTYPE)    # (B, Lm, D)
    x2d = xb.reshape(B * Lt, D)
    m2d = mb.reshape(B * Lm, D)

    # ---- self-attention, out_proj fused with residual + norm1 ----
    sa = prep["self_attn"]
    q = matmul(x2d, sa["w_q_t"], sa["b_q"])                    # (B*Lt, D)
    kv = matmul(x2d, sa["w_kv_t"], sa["b_kv"])                 # (B*Lt, 2D)
    o = attention(q.reshape(B, Lt, D), kv.reshape(B, Lt, 2 * D), nhead)
    x2d = matmul_add_layernorm(o.reshape(B * Lt, D), sa["w_out_t"], sa["b_out"],
                               x2d, prep["norm1_w"], prep["norm1_b"])

    # ---- cross-attention, out_proj fused with residual + norm2 ----
    ca = prep["cross_attn"]
    q = matmul(x2d, ca["w_q_t"], ca["b_q"])                    # (B*Lt, D)
    kv = matmul(m2d, ca["w_kv_t"], ca["b_kv"])                 # (B*Lm, 2D)
    o = attention(q.reshape(B, Lt, D), kv.reshape(B, Lm, 2 * D), nhead)
    x2d = matmul_add_layernorm(o.reshape(B * Lt, D), ca["w_out_t"], ca["b_out"],
                               x2d, prep["norm2_w"], prep["norm2_b"])

    # ---- feed-forward: linear1+ReLU, then linear2 fused with residual + norm3 ----
    h = matmul(x2d, prep["linear1_w_t"], prep["linear1_b"], relu=True)
    x2d = matmul_add_layernorm(h, prep["linear2_w_t"], prep["linear2_b"], x2d,
                               prep["norm3_w"], prep["norm3_b"],
                               out_dtype=jnp.float32)

    return x2d.reshape(B, Lt, D).transpose(1, 0, 2)            # back to (Lt, B, D)


# ----------------------------------------------------------------------------
# Pure-JAX reference (PyTorch DecoderLayer semantics).
#   cast=None            -> exact f32 semantics.
#   cast=quantize_bf16   -> quantizes weights / activations at the same points
#                           the kernels store bf16 (numerics-matched reference).
# ----------------------------------------------------------------------------
def quantize_bf16(x):
    return x.astype(jnp.bfloat16).astype(jnp.float32)


def _ref_ln(x, g, b, eps=LN_EPS):
    m = jnp.mean(x, axis=-1, keepdims=True)
    v = jnp.mean((x - m) ** 2, axis=-1, keepdims=True)
    return (x - m) * jax.lax.rsqrt(v + eps) * g + b


def ref_decoder_layer(tgt, memory, params, nhead, cast=None):
    if cast is None:
        cast = lambda a: a
    D = tgt.shape[-1]
    Dh = D // nhead
    scale = 1.0 / math.sqrt(Dh)

    def linear(x, w, b):                         # PyTorch Linear: x @ w.T + b
        return cast(x) @ cast(w).T + b

    def mha(q_in, k_in, v_in, p):
        Lq, B, _ = q_in.shape
        Lk = k_in.shape[0]
        w, b = p["in_proj_weight"], p["in_proj_bias"]
        q = cast(linear(q_in, w[:D] * scale, b[:D] * scale))
        k = cast(linear(k_in, w[D:2 * D], b[D:2 * D]))
        v = cast(linear(v_in, w[2 * D:], b[2 * D:]))
        q = q.reshape(Lq, B * nhead, Dh).transpose(1, 0, 2)
        k = k.reshape(Lk, B * nhead, Dh).transpose(1, 0, 2)
        v = v.reshape(Lk, B * nhead, Dh).transpose(1, 0, 2)
        s = jnp.einsum("bqd,bkd->bqk", q, k)
        a = jax.nn.softmax(s, axis=-1)
        o = jnp.einsum("bqk,bkd->bqd", cast(a), v)
        o = cast(o.transpose(1, 0, 2).reshape(Lq, B, D))
        return linear(o, p["out_proj_weight"], p["out_proj_bias"])

    x = cast(tgt)
    mem = cast(memory)
    t2 = mha(x, x, x, params["self_attn"])
    x = cast(_ref_ln(x + t2, params["norm1_w"], params["norm1_b"]))
    t2 = mha(x, mem, mem, params["cross_attn"])
    x = cast(_ref_ln(x + t2, params["norm2_w"], params["norm2_b"]))
    h = cast(jnp.maximum(linear(x, params["linear1_w"], params["linear1_b"]), 0.0))
    ff = linear(h, params["linear2_w"], params["linear2_b"])
    return _ref_ln(x + ff, params["norm3_w"], params["norm3_b"])


# ----------------------------------------------------------------------------
# Deterministic parameter init (PyTorch layout)
# ----------------------------------------------------------------------------
def make_params(key, d_model, nhead, dim_feedforward):
    ks = jax.random.split(key, 6)
    s = 0.05

    def mha_params(k1, k2):
        return {
            "in_proj_weight": s * jax.random.normal(k1, (3 * d_model, d_model), jnp.float32),
            "in_proj_bias": jnp.zeros((3 * d_model,), jnp.float32),
            "out_proj_weight": s * jax.random.normal(k2, (d_model, d_model), jnp.float32),
            "out_proj_bias": jnp.zeros((d_model,), jnp.float32),
        }

    return {
        "self_attn": mha_params(ks[0], ks[1]),
        "cross_attn": mha_params(ks[2], ks[3]),
        "linear1_w": s * jax.random.normal(ks[4], (dim_feedforward, d_model), jnp.float32),
        "linear1_b": jnp.zeros((dim_feedforward,), jnp.float32),
        "linear2_w": s * jax.random.normal(ks[5], (d_model, dim_feedforward), jnp.float32),
        "linear2_b": jnp.zeros((d_model,), jnp.float32),
        "norm1_w": jnp.ones((d_model,), jnp.float32),
        "norm1_b": jnp.zeros((d_model,), jnp.float32),
        "norm2_w": jnp.ones((d_model,), jnp.float32),
        "norm2_b": jnp.zeros((d_model,), jnp.float32),
        "norm3_w": jnp.ones((d_model,), jnp.float32),
        "norm3_b": jnp.zeros((d_model,), jnp.float32),
    }


if __name__ == "__main__":
    d_model, nhead, dim_ff = 32, 4, 64
    tgt_len, mem_len, batch = 8, 8, 2

    key = jax.random.PRNGKey(0)
    k_p, k_t, k_m = jax.random.split(key, 3)
    params = make_params(k_p, d_model, nhead, dim_ff)
    prep = prepare_params(params, d_model, nhead)   # one-time weight prep

    tgt = jax.random.normal(k_t, (tgt_len, batch, d_model), jnp.float32)
    memory = jax.random.normal(k_m, (mem_len, batch, d_model), jnp.float32)

    fwd = jax.jit(decoder_layer_forward, static_argnums=(3,))
    out = jax.block_until_ready(fwd(tgt, memory, prep, nhead))
    assert out.shape == (tgt_len, batch, d_model)
    assert bool(jnp.all(jnp.isfinite(out)))

    # Tight check vs a bf16-quantization-matched f32 reference.
    ref_bf = ref_decoder_layer(tgt, memory, params, nhead, cast=quantize_bf16)
    err_bf = float(jnp.max(jnp.abs(out - ref_bf)))
    assert err_bf < 2e-2, f"bf16-matched reference mismatch: {err_bf}"

    # Loose sanity check vs the exact f32 PyTorch-semantics reference
    # (kernel path is bf16, so only bf16-level agreement is expected).
    ref_f32 = ref_decoder_layer(tgt, memory, params, nhead)
    err_f32 = float(jnp.max(jnp.abs(out - ref_f32)))
    assert err_f32 < 2.5e-1, f"f32 reference sanity check: {err_f32}"

    print("KERNEL_OK")
</pallas_src>

<mosaic_0001>
module attributes {stable_mosaic.version = 11 : i64} {
  func.func @_matmul_kernel(%arg0: i32, %arg1: i32, %arg2: i32, %arg3: memref<16x32xbf16, #tpu.memory_space<vmem>>, %arg4: memref<32x32xbf16, #tpu.memory_space<vmem>>, %arg5: memref<1x32xf32, #tpu.memory_space<vmem>>, %arg6: memref<16x32xbf16, #tpu.memory_space<vmem>>, %arg7: memref<16x32xf32, #tpu.memory_space<vmem>>) attributes {dimension_semantics = [#tpu.dimension_semantics<parallel>, #tpu.dimension_semantics<parallel>, #tpu.dimension_semantics<arbitrary>], iteration_bounds = array<i64: 1, 1, 1>, scalar_prefetch = 0 : i64, scratch_operands = 1 : i64, tpu.core_type = #tpu.core_type<tc>, window_params = [{transform_indices = @transform_0, window_bounds = array<i64: 16, 32>}, {transform_indices = @transform_1, window_bounds = array<i64: 32, 32>}, {transform_indices = @transform_2, window_bounds = array<i64: 1, 32>}, {transform_indices = @transform_3, window_bounds = array<i64: 16, 32>}]} {
    %c0_i32 = arith.constant 0 : i32
    %0 = arith.cmpi eq, %arg2, %c0_i32 : i32
    %1 = arith.extui %0 : i1 to i32
    %c0_i32_0 = arith.constant 0 : i32
    %2 = arith.cmpi ne, %1, %c0_i32_0 : i32
    scf.if %2 {
      %cst_10 = arith.constant 0.000000e+00 : f32
      %12 = vector.broadcast %cst_10 : f32 to vector<16x32xf32>
      %c0_11 = arith.constant 0 : index
      %c0_12 = arith.constant 0 : index
      %13 = vector.load %arg7[%c0_11, %c0_12] : memref<16x32xf32, #tpu.memory_space<vmem>>, vector<16x32xf32>
      tpu.vector_store %arg7[%c0_11, %c0_12], %12 {strides = array<i32>} : memref<16x32xf32, #tpu.memory_space<vmem>>, vector<16x32xf32>,
    } else {
    }
    %c0 = arith.constant 0 : index
    %c0_1 = arith.constant 0 : index
    %3 = vector.load %arg7[%c0, %c0_1] : memref<16x32xf32, #tpu.memory_space<vmem>>, vector<16x32xf32>
    %c0_2 = arith.constant 0 : index
    %c0_3 = arith.constant 0 : index
    %4 = vector.load %arg3[%c0_2, %c0_3] : memref<16x32xbf16, #tpu.memory_space<vmem>>, vector<16x32xbf16>
    %c0_4 = arith.constant 0 : index
    %c0_5 = arith.constant 0 : index
    %5 = vector.load %arg4[%c0_4, %c0_5] : memref<32x32xbf16, #tpu.memory_space<vmem>>, vector<32x32xbf16>
    %cst = arith.constant dense<0.000000e+00> : vector<16x32xf32>
    %6 = tpu.matmul %4, %5, %cst {dimension_numbers = #tpu.dot_dimension_numbers<[1], [0], [0], [1], [0, 0, 1, 1], [], []>} : vector<16x32xbf16>, vector<32x32xbf16>, vector<16x32xf32> -> vector<16x32xf32>
    %7 = arith.addf %3, %6 : vector<16x32xf32>
    %c0_6 = arith.constant 0 : index
    %c0_7 = arith.constant 0 : index
    %8 = vector.load %arg7[%c0_6, %c0_7] : memref<16x32xf32, #tpu.memory_space<vmem>>, vector<16x32xf32>
    tpu.vector_store %arg7[%c0_6, %c0_7], %7 {strides = array<i32>} : memref<16x32xf32, #tpu.memory_space<vmem>>, vector<16x32xf32>,
    %c0_i32_8 = arith.constant 0 : i32
    %9 = arith.cmpi eq, %arg2, %c0_i32_8 : i32
    %10 = arith.extui %9 : i1 to i32
    %c0_i32_9 = arith.constant 0 : i32
    %11 = arith.cmpi ne, %10, %c0_i32_9 : i32
    scf.if %11 {
      %c0_10 = arith.constant 0 : index
      %c0_11 = arith.constant 0 : index
      %12 = vector.load %arg7[%c0_10, %c0_11] : memref<16x32xf32, #tpu.memory_space<vmem>>, vector<16x32xf32>
      %c0_12 = arith.constant 0 : index
      %c0_13 = arith.constant 0 : index
      %13 = vector.load %arg5[%c0_12, %c0_13] : memref<1x32xf32, #tpu.memory_space<vmem>>, vector<1x32xf32>
      %14 = vector.broadcast %13 : vector<1x32xf32> to vector<16x32xf32>
      %15 = arith.addf %12, %14 : vector<16x32xf32>
      %16 = arith.truncf %15 : vector<16x32xf32> to vector<16x32xbf16>
      %c0_14 = arith.constant 0 : index
      %c0_15 = arith.constant 0 : index
      %17 = vector.load %arg6[%c0_14, %c0_15] : memref<16x32xbf16, #tpu.memory_space<vmem>>, vector<16x32xbf16>
      tpu.vector_store %arg6[%c0_14, %c0_15], %16 {strides = array<i32>} : memref<16x32xbf16, #tpu.memory_space<vmem>>, vector<16x32xbf16>,
    } else {
    }
    return
  }
  func.func @transform_0(%arg0: i32, %arg1: i32, %arg2: i32) -> (i32, i32) {
    %c0_i32 = arith.constant 0 : i32
    return %arg0, %arg2 : i32, i32
  }
  func.func @transform_1(%arg0: i32, %arg1: i32, %arg2: i32) -> (i32, i32) {
    %c0_i32 = arith.constant 0 : i32
    return %arg2, %arg1 : i32, i32
  }
  func.func @transform_2(%arg0: i32, %arg1: i32, %arg2: i32) -> (i32, i32) {
    %c0_i32 = arith.constant 0 : i32
    %c0_i32_0 = arith.constant 0 : i32
    return %c0_i32, %arg1 : i32, i32
  }
  func.func @transform_3(%arg0: i32, %arg1: i32, %arg2: i32) -> (i32, i32) {
    %c0_i32 = arith.constant 0 : i32
    return %arg0, %arg1 : i32, i32
  }
}

module attributes {stable_mosaic.version = 11 : i64} {
  func.func @_matmul_kernel(%arg0: i32, %arg1: i32, %arg2: i32, %arg3: memref<16x32xbf16, #tpu.memory_space<vmem>>, %arg4: memref<32x64xbf16, #tpu.memory_space<vmem>>, %arg5: memref<1x64xf32, #tpu.memory_space<vmem>>, %arg6: memref<16x64xbf16, #tpu.memory_space<vmem>>, %arg7: memref<16x64xf32, #tpu.memory_space<vmem>>) attributes {dimension_semantics = [#tpu.dimension_semantics<parallel>, #tpu.dimension_semantics<parallel>, #tpu.dimension_semantics<arbitrary>], iteration_bounds = array<i64: 1, 1, 1>, scalar_prefetch = 0 : i64, scratch_operands = 1 : i64, tpu.core_type = #tpu.core_type<tc>, window_params = [{transform_indices = @transform_0, window_bounds = array<i64: 16, 32>}, {transform_indices = @transform_1, window_bounds = array<i64: 32, 64>}, {transform_indices = @transform_2, window_bounds = array<i64: 1, 64>}, {transform_indices = @transform_3, window_bounds = array<i64: 16, 64>}]} {
    %c0_i32 = arith.constant 0 : i32
    %0 = arith.cmpi eq, %arg2, %c0_i32 : i32
    %1 = arith.extui %0 : i1 to i32
    %c0_i32_0 = arith.constant 0 : i32
    %2 = arith.cmpi ne, %1, %c0_i32_0 : i32
    scf.if %2 {
      %cst_10 = arith.constant 0.000000e+00 : f32
      %12 = vector.broadcast %cst_10 : f32 to vector<16x64xf32>
      %c0_11 = arith.constant 0 : index
      %c0_12 = arith.constant 0 : index
      %13 = vector.load %arg7[%c0_11, %c0_12] : memref<16x64xf32, #tpu.memory_space<vmem>>, vector<16x64xf32>
      tpu.vector_store %arg7[%c0_11, %c0_12], %12 {strides = array<i32>} : memref<16x64xf32, #tpu.memory_space<vmem>>, vector<16x64xf32>,
    } else {
    }
    %c0 = arith.constant 0 : index
    %c0_1 = arith.constant 0 : index
    %3 = vector.load %arg7[%c0, %c0_1] : memref<16x64xf32, #tpu.memory_space<vmem>>, vector<16x64xf32>
    %c0_2 = arith.constant 0 : index
    %c0_3 = arith.constant 0 : index
    %4 = vector.load %arg3[%c0_2, %c0_3] : memref<16x32xbf16, #tpu.memory_space<vmem>>, vector<16x32xbf16>
    %c0_4 = arith.constant 0 : index
    %c0_5 = arith.constant 0 : index
    %5 = vector.load %arg4[%c0_4, %c0_5] : memref<32x64xbf16, #tpu.memory_space<vmem>>, vector<32x64xbf16>
    %cst = arith.constant dense<0.000000e+00> : vector<16x64xf32>
    %6 = tpu.matmul %4, %5, %cst {dimension_numbers = #tpu.dot_dimension_numbers<[1], [0], [0], [1], [0, 0, 1, 1], [], []>} : vector<16x32xbf16>, vector<32x64xbf16>, vector<16x64xf32> -> vector<16x64xf32>
    %7 = arith.addf %3, %6 : vector<16x64xf32>
    %c0_6 = arith.constant 0 : index
    %c0_7 = arith.constant 0 : index
    %8 = vector.load %arg7[%c0_6, %c0_7] : memref<16x64xf32, #tpu.memory_space<vmem>>, vector<16x64xf32>
    tpu.vector_store %arg7[%c0_6, %c0_7], %7 {strides = array<i32>} : memref<16x64xf32, #tpu.memory_space<vmem>>, vector<16x64xf32>,
    %c0_i32_8 = arith.constant 0 : i32
    %9 = arith.cmpi eq, %arg2, %c0_i32_8 : i32
    %10 = arith.extui %9 : i1 to i32
    %c0_i32_9 = arith.constant 0 : i32
    %11 = arith.cmpi ne, %10, %c0_i32_9 : i32
    scf.if %11 {
      %c0_10 = arith.constant 0 : index
      %c0_11 = arith.constant 0 : index
      %12 = vector.load %arg7[%c0_10, %c0_11] : memref<16x64xf32, #tpu.memory_space<vmem>>, vector<16x64xf32>
      %c0_12 = arith.constant 0 : index
      %c0_13 = arith.constant 0 : index
      %13 = vector.load %arg5[%c0_12, %c0_13] : memref<1x64xf32, #tpu.memory_space<vmem>>, vector<1x64xf32>
      %14 = vector.broadcast %13 : vector<1x64xf32> to vector<16x64xf32>
      %15 = arith.addf %12, %14 : vector<16x64xf32>
      %16 = arith.truncf %15 : vector<16x64xf32> to vector<16x64xbf16>
      %c0_14 = arith.constant 0 : index
      %c0_15 = arith.constant 0 : index
      %17 = vector.load %arg6[%c0_14, %c0_15] : memref<16x64xbf16, #tpu.memory_space<vmem>>, vector<16x64xbf16>
      tpu.vector_store %arg6[%c0_14, %c0_15], %16 {strides = array<i32>} : memref<16x64xbf16, #tpu.memory_space<vmem>>, vector<16x64xbf16>,
    } else {
    }
    return
  }
  func.func @transform_0(%arg0: i32, %arg1: i32, %arg2: i32) -> (i32, i32) {
    %c0_i32 = arith.constant 0 : i32
    return %arg0, %arg2 : i32, i32
  }
  func.func @transform_1(%arg0: i32, %arg1: i32, %arg2: i32) -> (i32, i32) {
    %c0_i32 = arith.constant 0 : i32
    return %arg2, %arg1 : i32, i32
  }
  func.func @transform_2(%arg0: i32, %arg1: i32, %arg2: i32) -> (i32, i32) {
    %c0_i32 = arith.constant 0 : i32
    %c0_i32_0 = arith.constant 0 : i32
    return %c0_i32, %arg1 : i32, i32
  }
  func.func @transform_3(%arg0: i32, %arg1: i32, %arg2: i32) -> (i32, i32) {
    %c0_i32 = arith.constant 0 : i32
    return %arg0, %arg1 : i32, i32
  }
}

module attributes {stable_mosaic.version = 11 : i64} {
  func.func @_matmul_add_ln_kernel(%arg0: i32, %arg1: i32, %arg2: memref<16x32xbf16, #tpu.memory_space<vmem>>, %arg3: memref<32x32xbf16, #tpu.memory_space<vmem>>, %arg4: memref<1x32xf32, #tpu.memory_space<vmem>>, %arg5: memref<16x32xbf16, #tpu.memory_space<vmem>>, %arg6: memref<1x32xf32, #tpu.memory_space<vmem>>, %arg7: memref<1x32xf32, #tpu.memory_space<vmem>>, %arg8: memref<16x32xbf16, #tpu.memory_space<vmem>>, %arg9: memref<16x32xf32, #tpu.memory_space<vmem>>) attributes {dimension_semantics = [#tpu.dimension_semantics<parallel>, #tpu.dimension_semantics<arbitrary>], iteration_bounds = array<i64: 1, 1>, scalar_prefetch = 0 : i64, scratch_operands = 1 : i64, tpu.core_type = #tpu.core_type<tc>, window_params = [{transform_indices = @transform_0, window_bounds = array<i64: 16, 32>}, {transform_indices = @transform_1, window_bounds = array<i64: 32, 32>}, {pipeline_mode = #tpu.pipeline_mode<synchronous>, transform_indices = @transform_2, window_bounds = array<i64: 1, 32>}, {transform_indices = @transform_3, window_bounds = array<i64: 16, 32>}, {pipeline_mode = #tpu.pipeline_mode<synchronous>, transform_indices = @transform_4, window_bounds = array<i64: 1, 32>}, {pipeline_mode = #tpu.pipeline_mode<synchronous>, transform_indices = @transform_5, window_bounds = array<i64: 1, 32>}, {transform_indices = @transform_6, window_bounds = array<i64: 16, 32>}]} {
    %c0_i32 = arith.constant 0 : i32
    %0 = arith.cmpi eq, %arg1, %c0_i32 : i32
    %1 = arith.extui %0 : i1 to i32
    %c0_i32_0 = arith.constant 0 : i32
    %2 = arith.cmpi ne, %1, %c0_i32_0 : i32
    scf.if %2 {
      %cst_10 = arith.constant 0.000000e+00 : f32
      %12 = vector.broadcast %cst_10 : f32 to vector<16x32xf32>
      %c0_11 = arith.constant 0 : index
      %c0_12 = arith.constant 0 : index
      %13 = vector.load %arg9[%c0_11, %c0_12] : memref<16x32xf32, #tpu.memory_space<vmem>>, vector<16x32xf32>
      tpu.vector_store %arg9[%c0_11, %c0_12], %12 {strides = array<i32>} : memref<16x32xf32, #tpu.memory_space<vmem>>, vector<16x32xf32>,
    } else {
    }
    %c0 = arith.constant 0 : index
    %c0_1 = arith.constant 0 : index
    %3 = vector.load %arg9[%c0, %c0_1] : memref<16x32xf32, #tpu.memory_space<vmem>>, vector<16x32xf32>
    %c0_2 = arith.constant 0 : index
    %c0_3 = arith.constant 0 : index
    %4 = vector.load %arg2[%c0_2, %c0_3] : memref<16x32xbf16, #tpu.memory_space<vmem>>, vector<16x32xbf16>
    %c0_4 = arith.constant 0 : index
    %c0_5 = arith.constant 0 : index
    %5 = vector.load %arg3[%c0_4, %c0_5] : memref<32x32xbf16, #tpu.memory_space<vmem>>, vector<32x32xbf16>
    %cst = arith.constant dense<0.000000e+00> : vector<16x32xf32>
    %6 = tpu.matmul %4, %5, %cst {dimension_numbers = #tpu.dot_dimension_numbers<[1], [0], [0], [1], [0, 0, 1, 1], [], []>} : vector<16x32xbf16>, vector<32x32xbf16>, vector<16x32xf32> -> vector<16x32xf32>
    %7 = arith.addf %3, %6 : vector<16x32xf32>
    %c0_6 = arith.constant 0 : index
    %c0_7 = arith.constant 0 : index
    %8 = vector.load %arg9[%c0_6, %c0_7] : memref<16x32xf32, #tpu.memory_space<vmem>>, vector<16x32xf32>
    tpu.vector_store %arg9[%c0_6, %c0_7], %7 {strides = array<i32>} : memref<16x32xf32, #tpu.memory_space<vmem>>, vector<16x32xf32>,
    %c0_i32_8 = arith.constant 0 : i32
    %9 = arith.cmpi eq, %arg1, %c0_i32_8 : i32
    %10 = arith.extui %9 : i1 to i32
    %c0_i32_9 = arith.constant 0 : i32
    %11 = arith.cmpi ne, %10, %c0_i32_9 : i32
    scf.if %11 {
      %c0_10 = arith.constant 0 : index
      %c0_11 = arith.constant 0 : index
      %12 = vector.load %arg9[%c0_10, %c0_11] : memref<16x32xf32, #tpu.memory_space<vmem>>, vector<16x32xf32>
      %c0_12 = arith.constant 0 : index
      %c0_13 = arith.constant 0 : index
      %13 = vector.load %arg4[%c0_12, %c0_13] : memref<1x32xf32, #tpu.memory_space<vmem>>, vector<1x32xf32>
      %14 = vector.broadcast %13 : vector<1x32xf32> to vector<16x32xf32>
      %15 = arith.addf %12, %14 : vector<16x32xf32>
      %c0_14 = arith.constant 0 : index
      %c0_15 = arith.constant 0 : index
      %16 = vector.load %arg5[%c0_14, %c0_15] : memref<16x32xbf16, #tpu.memory_space<vmem>>, vector<16x32xbf16>
      %17 = arith.extf %16 : vector<16x32xbf16> to vector<16x32xf32>
      %18 = arith.addf %15, %17 : vector<16x32xf32>
      %cst_16 = arith.constant dense<0.000000e+00> : vector<16xf32>
      %19 = vector.multi_reduction <add>, %18, %cst_16 [1] : vector<16x32xf32> to vector<16xf32>
      %20 = vector.shape_cast %19 : vector<16xf32> to vector<16x1xf32>
      %cst_17 = arith.constant 3.200000e+01 : f32
      %21 = vector.broadcast %cst_17 : f32 to vector<16x1xf32>
      %22 = arith.divf %20, %21 : vector<16x1xf32>
      %23 = vector.broadcast %22 : vector<16x1xf32> to vector<16x32xf32>
      %24 = arith.subf %18, %23 : vector<16x32xf32>
      %25 = arith.mulf %24, %24 : vector<16x32xf32>
      %cst_18 = arith.constant dense<0.000000e+00> : vector<16xf32>
      %26 = vector.multi_reduction <add>, %25, %cst_18 [1] : vector<16x32xf32> to vector<16xf32>
      %27 = vector.shape_cast %26 : vector<16xf32> to vector<16x1xf32>
      %cst_19 = arith.constant 3.200000e+01 : f32
      %28 = vector.broadcast %cst_19 : f32 to vector<16x1xf32>
      %29 = arith.divf %27, %28 : vector<16x1xf32>
      %cst_20 = arith.constant 9.99999974E-6 : f32
      %30 = vector.broadcast %cst_20 : f32 to vector<16x1xf32>
      %31 = arith.addf %29, %30 : vector<16x1xf32>
      %32 = math.rsqrt %31 : vector<16x1xf32>
      %33 = vector.broadcast %32 : vector<16x1xf32> to vector<16x32xf32>
      %34 = arith.mulf %24, %33 : vector<16x32xf32>
      %c0_21 = arith.constant 0 : index
      %c0_22 = arith.constant 0 : index
      %35 = vector.load %arg6[%c0_21, %c0_22] : memref<1x32xf32, #tpu.memory_space<vmem>>, vector<1x32xf32>
      %36 = vector.broadcast %35 : vector<1x32xf32> to vector<16x32xf32>
      %37 = arith.mulf %34, %36 : vector<16x32xf32>
      %c0_23 = arith.constant 0 : index
      %c0_24 = arith.constant 0 : index
      %38 = vector.load %arg7[%c0_23, %c0_24] : memref<1x32xf32, #tpu.memory_space<vmem>>, vector<1x32xf32>
      %39 = vector.broadcast %38 : vector<1x32xf32> to vector<16x32xf32>
      %40 = arith.addf %37, %39 : vector<16x32xf32>
      %41 = arith.truncf %40 : vector<16x32xf32> to vector<16x32xbf16>
      %c0_25 = arith.constant 0 : index
      %c0_26 = arith.constant 0 : index
      %42 = vector.load %arg8[%c0_25, %c0_26] : memref<16x32xbf16, #tpu.memory_space<vmem>>, vector<16x32xbf16>
      tpu.vector_store %arg8[%c0_25, %c0_26], %41 {strides = array<i32>} : memref<16x32xbf16, #tpu.memory_space<vmem>>, vector<16x32xbf16>,
    } else {
    }
    return
  }
  func.func @transform_0(%arg0: i32, %arg1: i32) -> (i32, i32) {
    %c0_i32 = arith.constant 0 : i32
    return %arg0, %arg1 : i32, i32
  }
  func.func @transform_1(%arg0: i32, %arg1: i32) -> (i32, i32) {
    %c0_i32 = arith.constant 0 : i32
    %c0_i32_0 = arith.constant 0 : i32
    return %arg1, %c0_i32 : i32, i32
  }
  func.func @transform_2(%arg0: i32, %arg1: i32) -> (i32, i32) {
    %c0_i32 = arith.constant 0 : i32
    %c0_i32_0 = arith.constant 0 : i32
    %c0_i32_1 = arith.constant 0 : i32
    return %c0_i32, %c0_i32_0 : i32, i32
  }
  func.func @transform_3(%arg0: i32, %arg1: i32) -> (i32, i32) {
    %c0_i32 = arith.constant 0 : i32
    %c0_i32_0 = arith.constant 0 : i32
    return %arg0, %c0_i32 : i32, i32
  }
  func.func @transform_4(%arg0: i32, %arg1: i32) -> (i32, i32) {
    %c0_i32 = arith.constant 0 : i32
    %c0_i32_0 = arith.constant 0 : i32
    %c0_i32_1 = arith.constant 0 : i32
    return %c0_i32, %c0_i32_0 : i32, i32
  }
  func.func @transform_5(%arg0: i32, %arg1: i32) -> (i32, i32) {
    %c0_i32 = arith.constant 0 : i32
    %c0_i32_0 = arith.constant 0 : i32
    %c0_i32_1 = arith.constant 0 : i32
    return %c0_i32, %c0_i32_0 : i32, i32
  }
  func.func @transform_6(%arg0: i32, %arg1: i32) -> (i32, i32) {
    %c0_i32 = arith.constant 0 : i32
    %c0_i32_0 = arith.constant 0 : i32
    return %arg0, %c0_i32 : i32, i32
  }
}

module attributes {stable_mosaic.version = 11 : i64} {
  func.func @_attn_kernel(%arg0: i32, %arg1: i32, %arg2: i32, %arg3: memref<1x8x32xbf16, #tpu.memory_space<vmem>>, %arg4: memref<1x8x64xbf16, #tpu.memory_space<vmem>>, %arg5: memref<1x8x32xbf16, #tpu.memory_space<vmem>>, %arg6: memref<4x8x1xf32, #tpu.memory_space<vmem>>, %arg7: memref<4x8x1xf32, #tpu.memory_space<vmem>>, %arg8: memref<4x8x8xf32, #tpu.memory_space<vmem>>) attributes {dimension_semantics = [#tpu.dimension_semantics<parallel>, #tpu.dimension_semantics<parallel>, #tpu.dimension_semantics<arbitrary>], iteration_bounds = array<i64: 2, 1, 1>, scalar_prefetch = 0 : i64, scratch_operands = 3 : i64, tpu.core_type = #tpu.core_type<tc>, window_params = [{transform_indices = @transform_0, window_bounds = array<i64: 1, 8, 32>}, {transform_indices = @transform_1, window_bounds = array<i64: 1, 8, 64>}, {transform_indices = @transform_2, window_bounds = array<i64: 1, 8, 32>}]} {
    %c0_i32 = arith.constant 0 : i32
    %0 = arith.cmpi eq, %arg2, %c0_i32 : i32
    %1 = arith.extui %0 : i1 to i32
    %c0_i32_0 = arith.constant 0 : i32
    %2 = arith.cmpi ne, %1, %c0_i32_0 : i32
    scf.if %2 {
      %cst_92 = arith.constant 0xFF800000 : f32
      %154 = vector.broadcast %cst_92 : f32 to vector<4x8x1xf32>
      %c0_93 = arith.constant 0 : index
      %c0_94 = arith.constant 0 : index
      %c0_95 = arith.constant 0 : index
      %155 = vector.load %arg6[%c0_93, %c0_94, %c0_95] : memref<4x8x1xf32, #tpu.memory_space<vmem>>, vector<4x8x1xf32>
      tpu.vector_store %arg6[%c0_93, %c0_94, %c0_95], %154 {strides = array<i32>} : memref<4x8x1xf32, #tpu.memory_space<vmem>>, vector<4x8x1xf32>,
      %cst_96 = arith.constant 0.000000e+00 : f32
      %156 = vector.broadcast %cst_96 : f32 to vector<4x8x1xf32>
      %c0_97 = arith.constant 0 : index
      %c0_98 = arith.constant 0 : index
      %c0_99 = arith.constant 0 : index
      %157 = vector.load %arg7[%c0_97, %c0_98, %c0_99] : memref<4x8x1xf32, #tpu.memory_space<vmem>>, vector<4x8x1xf32>
      tpu.vector_store %arg7[%c0_97, %c0_98, %c0_99], %156 {strides = array<i32>} : memref<4x8x1xf32, #tpu.memory_space<vmem>>, vector<4x8x1xf32>,
      %cst_100 = arith.constant 0.000000e+00 : f32
      %158 = vector.broadcast %cst_100 : f32 to vector<4x8x8xf32>
      %c0_101 = arith.constant 0 : index
      %c0_102 = arith.constant 0 : index
      %c0_103 = arith.constant 0 : index
      %159 = vector.load %arg8[%c0_101, %c0_102, %c0_103] : memref<4x8x8xf32, #tpu.memory_space<vmem>>, vector<4x8x8xf32>
      tpu.vector_store %arg8[%c0_101, %c0_102, %c0_103], %158 {strides = array<i32>} : memref<4x8x8xf32, #tpu.memory_space<vmem>>, vector<4x8x8xf32>,
    } else {
    }
    %c0 = arith.constant 0 : index
    %c0_1 = arith.constant 0 : index
    %c0_2 = arith.constant 0 : index
    %3 = vector.load %arg3[%c0, %c0_1, %c0_2] : memref<1x8x32xbf16, #tpu.memory_space<vmem>>, vector<1x8x32xbf16>
    %4 = vector.shape_cast %3 : vector<1x8x32xbf16> to vector<8x32xbf16>
    %c0_3 = arith.constant 0 : index
    %c0_4 = arith.constant 0 : index
    %c0_5 = arith.constant 0 : index
    %5 = vector.load %arg4[%c0_3, %c0_4, %c0_5] : memref<1x8x64xbf16, #tpu.memory_space<vmem>>, vector<1x8x64xbf16>
    %6 = vector.shape_cast %5 : vector<1x8x64xbf16> to vector<8x64xbf16>
    %7 = vector.extract_strided_slice %4 {offsets = [0, 0], sizes = [8, 8], strides = [1, 1]} : vector<8x32xbf16> to vector<8x8xbf16>
    %8 = vector.extract_strided_slice %6 {offsets = [0, 0], sizes = [8, 8], strides = [1, 1]} : vector<8x64xbf16> to vector<8x8xbf16>
    %9 = vector.extract_strided_slice %6 {offsets = [0, 32], sizes = [8, 8], strides = [1, 1]} : vector<8x64xbf16> to vector<8x8xbf16>
    %cst = arith.constant dense<0.000000e+00> : vector<8x8xf32>
    %10 = tpu.matmul %7, %8, %cst {dimension_numbers = #tpu.dot_dimension_numbers<[1], [1], [0], [0], [0, 0, 1, 0], [], []>} : vector<8x8xbf16>, vector<8x8xbf16>, vector<8x8xf32> -> vector<8x8xf32>
    %c0_6 = arith.constant 0 : index
    %c0_7 = arith.constant 0 : index
    %c0_8 = arith.constant 0 : index
    %11 = vector.load %arg6[%c0_6, %c0_7, %c0_8] : memref<4x8x1xf32, #tpu.memory_space<vmem>>, vector<1x8x1xf32>
    %12 = vector.shape_cast %11 : vector<1x8x1xf32> to vector<8x1xf32>
    %cst_9 = arith.constant dense<0xFF800000> : vector<8xf32>
    %13 = vector.multi_reduction <maximumf>, %10, %cst_9 [1] : vector<8x8xf32> to vector<8xf32>
    %14 = vector.shape_cast %13 : vector<8xf32> to vector<8x1xf32>
    %15 = arith.maximumf %12, %14 : vector<8x1xf32>
    %16 = arith.subf %12, %15 : vector<8x1xf32>
    %17 = math.exp %16 : vector<8x1xf32>
    %18 = vector.broadcast %15 : vector<8x1xf32> to vector<8x8xf32>
    %19 = arith.subf %10, %18 : vector<8x8xf32>
    %20 = math.exp %19 : vector<8x8xf32>
    %c0_10 = arith.constant 0 : index
    %c0_11 = arith.constant 0 : index
    %c0_12 = arith.constant 0 : index
    %21 = vector.load %arg7[%c0_10, %c0_11, %c0_12] : memref<4x8x1xf32, #tpu.memory_space<vmem>>, vector<1x8x1xf32>
    %22 = vector.shape_cast %21 : vector<1x8x1xf32> to vector<8x1xf32>
    %23 = arith.mulf %17, %22 : vector<8x1xf32>
    %cst_13 = arith.constant dense<0.000000e+00> : vector<8xf32>
    %24 = vector.multi_reduction <add>, %20, %cst_13 [1] : vector<8x8xf32> to vector<8xf32>
    %25 = vector.shape_cast %24 : vector<8xf32> to vector<8x1xf32>
    %26 = arith.addf %23, %25 : vector<8x1xf32>
    %c0_14 = arith.constant 0 : index
    %c0_15 = arith.constant 0 : index
    %c0_16 = arith.constant 0 : index
    %27 = vector.load %arg7[%c0_14, %c0_15, %c0_16] : memref<4x8x1xf32, #tpu.memory_space<vmem>>, vector<1x8x1xf32>
    %28 = vector.shape_cast %27 : vector<1x8x1xf32> to vector<8x1xf32>
    %29 = vector.shape_cast %26 : vector<8x1xf32> to vector<1x8x1xf32>
    tpu.vector_store %arg7[%c0_14, %c0_15, %c0_16], %29 {strides = array<i32>} : memref<4x8x1xf32, #tpu.memory_space<vmem>>, vector<1x8x1xf32>,
    %c0_17 = arith.constant 0 : index
    %c0_18 = arith.constant 0 : index
    %c0_19 = arith.constant 0 : index
    %30 = vector.load %arg8[%c0_17, %c0_18, %c0_19] : memref<4x8x8xf32, #tpu.memory_space<vmem>>, vector<1x8x8xf32>
    %31 = vector.shape_cast %30 : vector<1x8x8xf32> to vector<8x8xf32>
    %32 = vector.broadcast %17 : vector<8x1xf32> to vector<8x8xf32>
    %33 = arith.mulf %32, %31 : vector<8x8xf32>
    %34 = arith.truncf %20 : vector<8x8xf32> to vector<8x8xbf16>
    %cst_20 = arith.constant dense<0.000000e+00> : vector<8x8xf32>
    %35 = tpu.matmul %34, %9, %cst_20 {dimension_numbers = #tpu.dot_dimension_numbers<[1], [0], [0], [1], [0, 0, 1, 1], [], []>} : vector<8x8xbf16>, vector<8x8xbf16>, vector<8x8xf32> -> vector<8x8xf32>
    %36 = arith.addf %33, %35 : vector<8x8xf32>
    %c0_21 = arith.constant 0 : index
    %c0_22 = arith.constant 0 : index
    %c0_23 = arith.constant 0 : index
    %37 = vector.load %arg8[%c0_21, %c0_22, %c0_23] : memref<4x8x8xf32, #tpu.memory_space<vmem>>, vector<1x8x8xf32>
    %38 = vector.shape_cast %37 : vector<1x8x8xf32> to vector<8x8xf32>
    %39 = vector.shape_cast %36 : vector<8x8xf32> to vector<1x8x8xf32>
    tpu.vector_store %arg8[%c0_21, %c0_22, %c0_23], %39 {strides = array<i32>} : memref<4x8x8xf32, #tpu.memory_space<vmem>>, vector<1x8x8xf32>,
    %c0_24 = arith.constant 0 : index
    %c0_25 = arith.constant 0 : index
    %c0_26 = arith.constant 0 : index
    %40 = vector.load %arg6[%c0_24, %c0_25, %c0_26] : memref<4x8x1xf32, #tpu.memory_space<vmem>>, vector<1x8x1xf32>
    %41 = vector.shape_cast %40 : vector<1x8x1xf32> to vector<8x1xf32>
    %42 = vector.shape_cast %15 : vector<8x1xf32> to vector<1x8x1xf32>
    tpu.vector_store %arg6[%c0_24, %c0_25, %c0_26], %42 {strides = array<i32>} : memref<4x8x1xf32, #tpu.memory_space<vmem>>, vector<1x8x1xf32>,
    %43 = vector.extract_strided_slice %4 {offsets = [0, 8], sizes = [8, 8], strides = [1, 1]} : vector<8x32xbf16> to vector<8x8xbf16>
    %44 = vector.extract_strided_slice %6 {offsets = [0, 8], sizes = [8, 8], strides = [1, 1]} : vector<8x64xbf16> to vector<8x8xbf16>
    %45 = vector.extract_strided_slice %6 {offsets = [0, 40], sizes = [8, 8], strides = [1, 1]} : vector<8x64xbf16> to vector<8x8xbf16>
    %cst_27 = arith.constant dense<0.000000e+00> : vector<8x8xf32>
    %46 = tpu.matmul %43, %44, %cst_27 {dimension_numbers = #tpu.dot_dimension_numbers<[1], [1], [0], [0], [0, 0, 1, 0], [], []>} : vector<8x8xbf16>, vector<8x8xbf16>, vector<8x8xf32> -> vector<8x8xf32>
    %c1 = arith.constant 1 : index
    %c0_28 = arith.constant 0 : index
    %c0_29 = arith.constant 0 : index
    %47 = vector.load %arg6[%c1, %c0_28, %c0_29] : memref<4x8x1xf32, #tpu.memory_space<vmem>>, vector<1x8x1xf32>
    %48 = vector.shape_cast %47 : vector<1x8x1xf32> to vector<8x1xf32>
    %cst_30 = arith.constant dense<0xFF800000> : vector<8xf32>
    %49 = vector.multi_reduction <maximumf>, %46, %cst_30 [1] : vector<8x8xf32> to vector<8xf32>
    %50 = vector.shape_cast %49 : vector<8xf32> to vector<8x1xf32>
    %51 = arith.maximumf %48, %50 : vector<8x1xf32>
    %52 = arith.subf %48, %51 : vector<8x1xf32>
    %53 = math.exp %52 : vector<8x1xf32>
    %54 = vector.broadcast %51 : vector<8x1xf32> to vector<8x8xf32>
    %55 = arith.subf %46, %54 : vector<8x8xf32>
    %56 = math.exp %55 : vector<8x8xf32>
    %c1_31 = arith.constant 1 : index
    %c0_32 = arith.constant 0 : index
    %c0_33 = arith.constant 0 : index
    %57 = vector.load %arg7[%c1_31, %c0_32, %c0_33] : memref<4x8x1xf32, #tpu.memory_space<vmem>>, vector<1x8x1xf32>
    %58 = vector.shape_cast %57 : vector<1x8x1xf32> to vector<8x1xf32>
    %59 = arith.mulf %53, %58 : vector<8x1xf32>
    %cst_34 = arith.constant dense<0.000000e+00> : vector<8xf32>
    %60 = vector.multi_reduction <add>, %56, %cst_34 [1] : vector<8x8xf32> to vector<8xf32>
    %61 = vector.shape_cast %60 : vector<8xf32> to vector<8x1xf32>
    %62 = arith.addf %59, %61 : vector<8x1xf32>
    %c1_35 = arith.constant 1 : index
    %c0_36 = arith.constant 0 : index
    %c0_37 = arith.constant 0 : index
    %63 = vector.load %arg7[%c1_35, %c0_36, %c0_37] : memref<4x8x1xf32, #tpu.memory_space<vmem>>, vector<1x8x1xf32>
    %64 = vector.shape_cast %63 : vector<1x8x1xf32> to vector<8x1xf32>
    %65 = vector.shape_cast %62 : vector<8x1xf32> to vector<1x8x1xf32>
    tpu.vector_store %arg7[%c1_35, %c0_36, %c0_37], %65 {strides = array<i32>} : memref<4x8x1xf32, #tpu.memory_space<vmem>>, vector<1x8x1xf32>,
    %c1_38 = arith.constant 1 : index
    %c0_39 = arith.constant 0 : index
    %c0_40 = arith.constant 0 : index
    %66 = vector.load %arg8[%c1_38, %c0_39, %c0_40] : memref<4x8x8xf32, #tpu.memory_space<vmem>>, vector<1x8x8xf32>
    %67 = vector.shape_cast %66 : vector<1x8x8xf32> to vector<8x8xf32>
    %68 = vector.broadcast %53 : vector<8x1xf32> to vector<8x8xf32>
    %69 = arith.mulf %68, %67 : vector<8x8xf32>
    %70 = arith.truncf %56 : vector<8x8xf32> to vector<8x8xbf16>
    %cst_41 = arith.constant dense<0.000000e+00> : vector<8x8xf32>
    %71 = tpu.matmul %70, %45, %cst_41 {dimension_numbers = #tpu.dot_dimension_numbers<[1], [0], [0], [1], [0, 0, 1, 1], [], []>} : vector<8x8xbf16>, vector<8x8xbf16>, vector<8x8xf32> -> vector<8x8xf32>
    %72 = arith.addf %69, %71 : vector<8x8xf32>
    %c1_42 = arith.constant 1 : index
    %c0_43 = arith.constant 0 : index
    %c0_44 = arith.constant 0 : index
    %73 = vector.load %arg8[%c1_42, %c0_43, %c0_44] : memref<4x8x8xf32, #tpu.memory_space<vmem>>, vector<1x8x8xf32>
    %74 = vector.shape_cast %73 : vector<1x8x8xf32> to vector<8x8xf32>
    %75 = vector.shape_cast %72 : vector<8x8xf32> to vector<1x8x8xf32>
    tpu.vector_store %arg8[%c1_42, %c0_43, %c0_44], %75 {strides = array<i32>} : memref<4x8x8xf32, #tpu.memory_space<vmem>>, vector<1x8x8xf32>,
    %c1_45 = arith.constant 1 : index
    %c0_46 = arith.constant 0 : index
    %c0_47 = arith.constant 0 : index
    %76 = vector.load %arg6[%c1_45, %c0_46, %c0_47] : memref<4x8x1xf32, #tpu.memory_space<vmem>>, vector<1x8x1xf32>
    %77 = vector.shape_cast %76 : vector<1x8x1xf32> to vector<8x1xf32>
    %78 = vector.shape_cast %51 : vector<8x1xf32> to vector<1x8x1xf32>
    tpu.vector_store %arg6[%c1_45, %c0_46, %c0_47], %78 {strides = array<i32>} : memref<4x8x1xf32, #tpu.memory_space<vmem>>, vector<1x8x1xf32>,
    %79 = vector.extract_strided_slice %4 {offsets = [0, 16], sizes = [8, 8], strides = [1, 1]} : vector<8x32xbf16> to vector<8x8xbf16>
    %80 = vector.extract_strided_slice %6 {offsets = [0, 16], sizes = [8, 8], strides = [1, 1]} : vector<8x64xbf16> to vector<8x8xbf16>
    %81 = vector.extract_strided_slice %6 {offsets = [0, 48], sizes = [8, 8], strides = [1, 1]} : vector<8x64xbf16> to vector<8x8xbf16>
    %cst_48 = arith.constant dense<0.000000e+00> : vector<8x8xf32>
    %82 = tpu.matmul %79, %80, %cst_48 {dimension_numbers = #tpu.dot_dimension_numbers<[1], [1], [0], [0], [0, 0, 1, 0], [], []>} : vector<8x8xbf16>, vector<8x8xbf16>, vector<8x8xf32> -> vector<8x8xf32>
    %c2 = arith.constant 2 : index
    %c0_49 = arith.constant 0 : index
    %c0_50 = arith.constant 0 : index
    %83 = vector.load %arg6[%c2, %c0_49, %c0_50] : memref<4x8x1xf32, #tpu.memory_space<vmem>>, vector<1x8x1xf32>
    %84 = vector.shape_cast %83 : vector<1x8x1xf32> to vector<8x1xf32>
    %cst_51 = arith.constant dense<0xFF800000> : vector<8xf32>
    %85 = vector.multi_reduction <maximumf>, %82, %cst_51 [1] : vector<8x8xf32> to vector<8xf32>
    %86 = vector.shape_cast %85 : vector<8xf32> to vector<8x1xf32>
    %87 = arith.maximumf %84, %86 : vector<8x1xf32>
    %88 = arith.subf %84, %87 : vector<8x1xf32>
    %89 = math.exp %88 : vector<8x1xf32>
    %90 = vector.broadcast %87 : vector<8x1xf32> to vector<8x8xf32>
    %91 = arith.subf %82, %90 : vector<8x8xf32>
    %92 = math.exp %91 : vector<8x8xf32>
    %c2_52 = arith.constant 2 : index
    %c0_53 = arith.constant 0 : index
    %c0_54 = arith.constant 0 : index
    %93 = vector.load %arg7[%c2_52, %c0_53, %c0_54] : memref<4x8x1xf32, #tpu.memory_space<vmem>>, vector<1x8x1xf32>
    %94 = vector.shape_cast %93 : vector<1x8x1xf32> to vector<8x1xf32>
    %95 = arith.mulf %89, %94 : vector<8x1xf32>
    %cst_55 = arith.constant dense<0.000000e+00> : vector<8xf32>
    %96 = vector.multi_reduction <add>, %92, %cst_55 [1] : vector<8x8xf32> to vector<8xf32>
    %97 = vector.shape_cast %96 : vector<8xf32> to vector<8x1xf32>
    %98 = arith.addf %95, %97 : vector<8x1xf32>
    %c2_56 = arith.constant 2 : index
    %c0_57 = arith.constant 0 : index
    %c0_58 = arith.constant 0 : index
    %99 = vector.load %arg7[%c2_56, %c0_57, %c0_58] : memref<4x8x1xf32, #tpu.memory_space<vmem>>, vector<1x8x1xf32>
    %100 = vector.shape_cast %99 : vector<1x8x1xf32> to vector<8x1xf32>
    %101 = vector.shape_cast %98 : vector<8x1xf32> to vector<1x8x1xf32>
    tpu.vector_store %arg7[%c2_56, %c0_57, %c0_58], %101 {strides = array<i32>} : memref<4x8x1xf32, #tpu.memory_space<vmem>>, vector<1x8x1xf32>,
    %c2_59 = arith.constant 2 : index
    %c0_60 = arith.constant 0 : index
    %c0_61 = arith.constant 0 : index
    %102 = vector.load %arg8[%c2_59, %c0_60, %c0_61] : memref<4x8x8xf32, #tpu.memory_space<vmem>>, vector<1x8x8xf32>
    %103 = vector.shape_cast %102 : vector<1x8x8xf32> to vector<8x8xf32>
    %104 = vector.broadcast %89 : vector<8x1xf32> to vector<8x8xf32>
    %105 = arith.mulf %104, %103 : vector<8x8xf32>
    %106 = arith.truncf %92 : vector<8x8xf32> to vector<8x8xbf16>
    %cst_62 = arith.constant dense<0.000000e+00> : vector<8x8xf32>
    %107 = tpu.matmul %106, %81, %cst_62 {dimension_numbers = #tpu.dot_dimension_numbers<[1], [0], [0], [1], [0, 0, 1, 1], [], []>} : vector<8x8xbf16>, vector<8x8xbf16>, vector<8x8xf32> -> vector<8x8xf32>
    %108 = arith.addf %105, %107 : vector<8x8xf32>
    %c2_63 = arith.constant 2 : index
    %c0_64 = arith.constant 0 : index
    %c0_65 = arith.constant 0 : index
    %109 = vector.load %arg8[%c2_63, %c0_64, %c0_65] : memref<4x8x8xf32, #tpu.memory_space<vmem>>, vector<1x8x8xf32>
    %110 = vector.shape_cast %109 : vector<1x8x8xf32> to vector<8x8xf32>
    %111 = vector.shape_cast %108 : vector<8x8xf32> to vector<1x8x8xf32>
    tpu.vector_store %arg8[%c2_63, %c0_64, %c0_65], %111 {strides = array<i32>} : memref<4x8x8xf32, #tpu.memory_space<vmem>>, vector<1x8x8xf32>,
    %c2_66 = arith.constant 2 : index
    %c0_67 = arith.constant 0 : index
    %c0_68 = arith.constant 0 : index
    %112 = vector.load %arg6[%c2_66, %c0_67, %c0_68] : memref<4x8x1xf32, #tpu.memory_space<vmem>>, vector<1x8x1xf32>
    %113 = vector.shape_cast %112 : vector<1x8x1xf32> to vector<8x1xf32>
    %114 = vector.shape_cast %87 : vector<8x1xf32> to vector<1x8x1xf32>
    tpu.vector_store %arg6[%c2_66, %c0_67, %c0_68], %114 {strides = array<i32>} : memref<4x8x1xf32, #tpu.memory_space<vmem>>, vector<1x8x1xf32>,
    %115 = vector.extract_strided_slice %4 {offsets = [0, 24], sizes = [8, 8], strides = [1, 1]} : vector<8x32xbf16> to vector<8x8xbf16>
    %116 = vector.extract_strided_slice %6 {offsets = [0, 24], sizes = [8, 8], strides = [1, 1]} : vector<8x64xbf16> to vector<8x8xbf16>
    %117 = vector.extract_strided_slice %6 {offsets = [0, 56], sizes = [8, 8], strides = [1, 1]} : vector<8x64xbf16> to vector<8x8xbf16>
    %cst_69 = arith.constant dense<0.000000e+00> : vector<8x8xf32>
    %118 = tpu.matmul %115, %116, %cst_69 {dimension_numbers = #tpu.dot_dimension_numbers<[1], [1], [0], [0], [0, 0, 1, 0], [], []>} : vector<8x8xbf16>, vector<8x8xbf16>, vector<8x8xf32> -> vector<8x8xf32>
    %c3 = arith.constant 3 : index
    %c0_70 = arith.constant 0 : index
    %c0_71 = arith.constant 0 : index
    %119 = vector.load %arg6[%c3, %c0_70, %c0_71] : memref<4x8x1xf32, #tpu.memory_space<vmem>>, vector<1x8x1xf32>
    %120 = vector.shape_cast %119 : vector<1x8x1xf32> to vector<8x1xf32>
    %cst_72 = arith.constant dense<0xFF800000> : vector<8xf32>
    %121 = vector.multi_reduction <maximumf>, %118, %cst_72 [1] : vector<8x8xf32> to vector<8xf32>
    %122 = vector.shape_cast %121 : vector<8xf32> to vector<8x1xf32>
    %123 = arith.maximumf %120, %122 : vector<8x1xf32>
    %124 = arith.subf %120, %123 : vector<8x1xf32>
    %125 = math.exp %124 : vector<8x1xf32>
    %126 = vector.broadcast %123 : vector<8x1xf32> to vector<8x8xf32>
    %127 = arith.subf %118, %126 : vector<8x8xf32>
    %128 = math.exp %127 : vector<8x8xf32>
    %c3_73 = arith.constant 3 : index
    %c0_74 = arith.constant 0 : index
    %c0_75 = arith.constant 0 : index
    %129 = vector.load %arg7[%c3_73, %c0_74, %c0_75] : memref<4x8x1xf32, #tpu.memory_space<vmem>>, vector<1x8x1xf32>
    %130 = vector.shape_cast %129 : vector<1x8x1xf32> to vector<8x1xf32>
    %131 = arith.mulf %125, %130 : vector<8x1xf32>
    %cst_76 = arith.constant dense<0.000000e+00> : vector<8xf32>
    %132 = vector.multi_reduction <add>, %128, %cst_76 [1] : vector<8x8xf32> to vector<8xf32>
    %133 = vector.shape_cast %132 : vector<8xf32> to vector<8x1xf32>
    %134 = arith.addf %131, %133 : vector<8x1xf32>
    %c3_77 = arith.constant 3 : index
    %c0_78 = arith.constant 0 : index
    %c0_79 = arith.constant 0 : index
    %135 = vector.load %arg7[%c3_77, %c0_78, %c0_79] : memref<4x8x1xf32, #tpu.memory_space<vmem>>, vector<1x8x1xf32>
    %136 = vector.shape_cast %135 : vector<1x8x1xf32> to vector<8x1xf32>
    %137 = vector.shape_cast %134 : vector<8x1xf32> to vector<1x8x1xf32>
    tpu.vector_store %arg7[%c3_77, %c0_78, %c0_79], %137 {strides = array<i32>} : memref<4x8x1xf32, #tpu.memory_space<vmem>>, vector<1x8x1xf32>,
    %c3_80 = arith.constant 3 : index
    %c0_81 = arith.constant 0 : index
    %c0_82 = arith.constant 0 : index
    %138 = vector.load %arg8[%c3_80, %c0_81, %c0_82] : memref<4x8x8xf32, #tpu.memory_space<vmem>>, vector<1x8x8xf32>
    %139 = vector.shape_cast %138 : vector<1x8x8xf32> to vector<8x8xf32>
    %140 = vector.broadcast %125 : vector<8x1xf32> to vector<8x8xf32>
    %141 = arith.mulf %140, %139 : vector<8x8xf32>
    %142 = arith.truncf %128 : vector<8x8xf32> to vector<8x8xbf16>
    %cst_83 = arith.constant dense<0.000000e+00> : vector<8x8xf32>
    %143 = tpu.matmul %142, %117, %cst_83 {dimension_numbers = #tpu.dot_dimension_numbers<[1], [0], [0], [1], [0, 0, 1, 1], [], []>} : vector<8x8xbf16>, vector<8x8xbf16>, vector<8x8xf32> -> vector<8x8xf32>
    %144 = arith.addf %141, %143 : vector<8x8xf32>
    %c3_84 = arith.constant 3 : index
    %c0_85 = arith.constant 0 : index
    %c0_86 = arith.constant 0 : index
    %145 = vector.load %arg8[%c3_84, %c0_85, %c0_86] : memref<4x8x8xf32, #tpu.memory_space<vmem>>, vector<1x8x8xf32>
    %146 = vector.shape_cast %145 : vector<1x8x8xf32> to vector<8x8xf32>
    %147 = vector.shape_cast %144 : vector<8x8xf32> to vector<1x8x8xf32>
    tpu.vector_store %arg8[%c3_84, %c0_85, %c0_86], %147 {strides = array<i32>} : memref<4x8x8xf32, #tpu.memory_space<vmem>>, vector<1x8x8xf32>,
    %c3_87 = arith.constant 3 : index
    %c0_88 = arith.constant 0 : index
    %c0_89 = arith.constant 0 : index
    %148 = vector.load %arg6[%c3_87, %c0_88, %c0_89] : memref<4x8x1xf32, #tpu.memory_space<vmem>>, vector<1x8x1xf32>
    %149 = vector.shape_cast %148 : vector<1x8x1xf32> to vector<8x1xf32>
    %150 = vector.shape_cast %123 : vector<8x1xf32> to vector<1x8x1xf32>
    tpu.vector_store %arg6[%c3_87, %c0_88, %c0_89], %150 {strides = array<i32>} : memref<4x8x1xf32, #tpu.memory_space<vmem>>, vector<1x8x1xf32>,
    %c0_i32_90 = arith.constant 0 : i32
    %151 = arith.cmpi eq, %arg2, %c0_i32_90 : i32
    %152 = arith.extui %151 : i1 to i32
    %c0_i32_91 = arith.constant 0 : i32
    %153 = arith.cmpi ne, %152, %c0_i32_91 : i32
    scf.if %153 {
      %c0_92 = arith.constant 0 : index
      %c0_93 = arith.constant 0 : index
      %c0_94 = arith.constant 0 : index
      %154 = vector.load %arg7[%c0_92, %c0_93, %c0_94] : memref<4x8x1xf32, #tpu.memory_space<vmem>>, vector<1x8x1xf32>
      %155 = vector.shape_cast %154 : vector<1x8x1xf32> to vector<8x1xf32>
      %156 = tpu.reciprocal %155 {approx = true} : vector<8x1xf32> -> vector<8x1xf32>
      %c0_95 = arith.constant 0 : index
      %c0_96 = arith.constant 0 : index
      %c0_97 = arith.constant 0 : index
      %157 = vector.load %arg8[%c0_95, %c0_96, %c0_97] : memref<4x8x8xf32, #tpu.memory_space<vmem>>, vector<1x8x8xf32>
      %158 = vector.shape_cast %157 : vector<1x8x8xf32> to vector<8x8xf32>
      %159 = vector.broadcast %156 : vector<8x1xf32> to vector<8x8xf32>
      %160 = arith.mulf %158, %159 : vector<8x8xf32>
      %c1_98 = arith.constant 1 : index
      %c0_99 = arith.constant 0 : index
      %c0_100 = arith.constant 0 : index
      %161 = vector.load %arg7[%c1_98, %c0_99, %c0_100] : memref<4x8x1xf32, #tpu.memory_space<vmem>>, vector<1x8x1xf32>
      %162 = vector.shape_cast %161 : vector<1x8x1xf32> to vector<8x1xf32>
      %163 = tpu.reciprocal %162 {approx = true} : vector<8x1xf32> -> vector<8x1xf32>
      %c1_101 = arith.constant 1 : index
      %c0_102 = arith.constant 0 : index
      %c0_103 = arith.constant 0 : index
      %164 = vector.load %arg8[%c1_101, %c0_102, %c0_103] : memref<4x8x8xf32, #tpu.memory_space<vmem>>, vector<1x8x8xf32>
      %165 = vector.shape_cast %164 : vector<1x8x8xf32> to vector<8x8xf32>
      %166 = vector.broadcast %163 : vector<8x1xf32> to vector<8x8xf32>
      %167 = arith.mulf %165, %166 : vector<8x8xf32>
      %c2_104 = arith.constant 2 : index
      %c0_105 = arith.constant 0 : index
      %c0_106 = arith.constant 0 : index
      %168 = vector.load %arg7[%c2_104, %c0_105, %c0_106] : memref<4x8x1xf32, #tpu.memory_space<vmem>>, vector<1x8x1xf32>
      %169 = vector.shape_cast %168 : vector<1x8x1xf32> to vector<8x1xf32>
      %170 = tpu.reciprocal %169 {approx = true} : vector<8x1xf32> -> vector<8x1xf32>
      %c2_107 = arith.constant 2 : index
      %c0_108 = arith.constant 0 : index
      %c0_109 = arith.constant 0 : index
      %171 = vector.load %arg8[%c2_107, %c0_108, %c0_109] : memref<4x8x8xf32, #tpu.memory_space<vmem>>, vector<1x8x8xf32>
      %172 = vector.shape_cast %171 : vector<1x8x8xf32> to vector<8x8xf32>
      %173 = vector.broadcast %170 : vector<8x1xf32> to vector<8x8xf32>
      %174 = arith.mulf %172, %173 : vector<8x8xf32>
      %c3_110 = arith.constant 3 : index
      %c0_111 = arith.constant 0 : index
      %c0_112 = arith.constant 0 : index
      %175 = vector.load %arg7[%c3_110, %c0_111, %c0_112] : memref<4x8x1xf32, #tpu.memory_space<vmem>>, vector<1x8x1xf32>
      %176 = vector.shape_cast %175 : vector<1x8x1xf32> to vector<8x1xf32>
      %177 = tpu.reciprocal %176 {approx = true} : vector<8x1xf32> -> vector<8x1xf32>
      %c3_113 = arith.constant 3 : index
      %c0_114 = arith.constant 0 : index
      %c0_115 = arith.constant 0 : index
      %178 = vector.load %arg8[%c3_113, %c0_114, %c0_115] : memref<4x8x8xf32, #tpu.memory_space<vmem>>, vector<1x8x8xf32>
      %179 = vector.shape_cast %178 : vector<1x8x8xf32> to vector<8x8xf32>
      %180 = vector.broadcast %177 : vector<8x1xf32> to vector<8x8xf32>
      %181 = arith.mulf %179, %180 : vector<8x8xf32>
      %182 = tpu.concatenate %160, %167, %174, %181 in 1 : vector<8x8xf32>, vector<8x8xf32>, vector<8x8xf32>, vector<8x8xf32> -> vector<8x32xf32>
      %183 = arith.truncf %182 : vector<8x32xf32> to vector<8x32xbf16>
      %c0_116 = arith.constant 0 : index
      %c0_117 = arith.constant 0 : index
      %c0_118 = arith.constant 0 : index
      %184 = vector.load %arg5[%c0_116, %c0_117, %c0_118] : memref<1x8x32xbf16, #tpu.memory_space<vmem>>, vector<1x8x32xbf16>
      %185 = vector.shape_cast %184 : vector<1x8x32xbf16> to vector<8x32xbf16>
      %186 = vector.shape_cast %183 : vector<8x32xbf16> to vector<1x8x32xbf16>
      tpu.vector_store %arg5[%c0_116, %c0_117, %c0_118], %186 {strides = array<i32>} : memref<1x8x32xbf16, #tpu.memory_space<vmem>>, vector<1x8x32xbf16>,
    } else {
    }
    return
  }
  func.func @transform_0(%arg0: i32, %arg1: i32, %arg2: i32) -> (i32, i32, i32) {
    %c0_i32 = arith.constant 0 : i32
    %c0_i32_0 = arith.constant 0 : i32
    return %arg0, %arg1, %c0_i32 : i32, i32, i32
  }
  func.func @transform_1(%arg0: i32, %arg1: i32, %arg2: i32) -> (i32, i32, i32) {
    %c0_i32 = arith.constant 0 : i32
    %c0_i32_0 = arith.constant 0 : i32
    return %arg0, %arg2, %c0_i32 : i32, i32, i32
  }
  func.func @transform_2(%arg0: i32, %arg1: i32, %arg2: i32) -> (i32, i32, i32) {
    %c0_i32 = arith.constant 0 : i32
    %c0_i32_0 = arith.constant 0 : i32
    return %arg0, %arg1, %c0_i32 : i32, i32, i32
  }
}

module attributes {stable_mosaic.version = 11 : i64} {
  func.func @_matmul_kernel(%arg0: i32, %arg1: i32, %arg2: i32, %arg3: memref<16x32xbf16, #tpu.memory_space<vmem>>, %arg4: memref<32x64xbf16, #tpu.memory_space<vmem>>, %arg5: memref<1x64xf32, #tpu.memory_space<vmem>>, %arg6: memref<16x64xbf16, #tpu.memory_space<vmem>>, %arg7: memref<16x64xf32, #tpu.memory_space<vmem>>) attributes {dimension_semantics = [#tpu.dimension_semantics<parallel>, #tpu.dimension_semantics<parallel>, #tpu.dimension_semantics<arbitrary>], iteration_bounds = array<i64: 1, 1, 1>, scalar_prefetch = 0 : i64, scratch_operands = 1 : i64, tpu.core_type = #tpu.core_type<tc>, window_params = [{transform_indices = @transform_0, window_bounds = array<i64: 16, 32>}, {transform_indices = @transform_1, window_bounds = array<i64: 32, 64>}, {transform_indices = @transform_2, window_bounds = array<i64: 1, 64>}, {transform_indices = @transform_3, window_bounds = array<i64: 16, 64>}]} {
    %c0_i32 = arith.constant 0 : i32
    %0 = arith.cmpi eq, %arg2, %c0_i32 : i32
    %1 = arith.extui %0 : i1 to i32
    %c0_i32_0 = arith.constant 0 : i32
    %2 = arith.cmpi ne, %1, %c0_i32_0 : i32
    scf.if %2 {
      %cst_10 = arith.constant 0.000000e+00 : f32
      %12 = vector.broadcast %cst_10 : f32 to vector<16x64xf32>
      %c0_11 = arith.constant 0 : index
      %c0_12 = arith.constant 0 : index
      %13 = vector.load %arg7[%c0_11, %c0_12] : memref<16x64xf32, #tpu.memory_space<vmem>>, vector<16x64xf32>
      tpu.vector_store %arg7[%c0_11, %c0_12], %12 {strides = array<i32>} : memref<16x64xf32, #tpu.memory_space<vmem>>, vector<16x64xf32>,
    } else {
    }
    %c0 = arith.constant 0 : index
    %c0_1 = arith.constant 0 : index
    %3 = vector.load %arg7[%c0, %c0_1] : memref<16x64xf32, #tpu.memory_space<vmem>>, vector<16x64xf32>
    %c0_2 = arith.constant 0 : index
    %c0_3 = arith.constant 0 : index
    %4 = vector.load %arg3[%c0_2, %c0_3] : memref<16x32xbf16, #tpu.memory_space<vmem>>, vector<16x32xbf16>
    %c0_4 = arith.constant 0 : index
    %c0_5 = arith.constant 0 : index
    %5 = vector.load %arg4[%c0_4, %c0_5] : memref<32x64xbf16, #tpu.memory_space<vmem>>, vector<32x64xbf16>
    %cst = arith.constant dense<0.000000e+00> : vector<16x64xf32>
    %6 = tpu.matmul %4, %5, %cst {dimension_numbers = #tpu.dot_dimension_numbers<[1], [0], [0], [1], [0, 0, 1, 1], [], []>} : vector<16x32xbf16>, vector<32x64xbf16>, vector<16x64xf32> -> vector<16x64xf32>
    %7 = arith.addf %3, %6 : vector<16x64xf32>
    %c0_6 = arith.constant 0 : index
    %c0_7 = arith.constant 0 : index
    %8 = vector.load %arg7[%c0_6, %c0_7] : memref<16x64xf32, #tpu.memory_space<vmem>>, vector<16x64xf32>
    tpu.vector_store %arg7[%c0_6, %c0_7], %7 {strides = array<i32>} : memref<16x64xf32, #tpu.memory_space<vmem>>, vector<16x64xf32>,
    %c0_i32_8 = arith.constant 0 : i32
    %9 = arith.cmpi eq, %arg2, %c0_i32_8 : i32
    %10 = arith.extui %9 : i1 to i32
    %c0_i32_9 = arith.constant 0 : i32
    %11 = arith.cmpi ne, %10, %c0_i32_9 : i32
    scf.if %11 {
      %c0_10 = arith.constant 0 : index
      %c0_11 = arith.constant 0 : index
      %12 = vector.load %arg7[%c0_10, %c0_11] : memref<16x64xf32, #tpu.memory_space<vmem>>, vector<16x64xf32>
      %c0_12 = arith.constant 0 : index
      %c0_13 = arith.constant 0 : index
      %13 = vector.load %arg5[%c0_12, %c0_13] : memref<1x64xf32, #tpu.memory_space<vmem>>, vector<1x64xf32>
      %14 = vector.broadcast %13 : vector<1x64xf32> to vector<16x64xf32>
      %15 = arith.addf %12, %14 : vector<16x64xf32>
      %cst_14 = arith.constant 0.000000e+00 : f32
      %16 = vector.broadcast %cst_14 : f32 to vector<16x64xf32>
      %17 = arith.maximumf %15, %16 : vector<16x64xf32>
      %18 = arith.truncf %17 : vector<16x64xf32> to vector<16x64xbf16>
      %c0_15 = arith.constant 0 : index
      %c0_16 = arith.constant 0 : index
      %19 = vector.load %arg6[%c0_15, %c0_16] : memref<16x64xbf16, #tpu.memory_space<vmem>>, vector<16x64xbf16>
      tpu.vector_store %arg6[%c0_15, %c0_16], %18 {strides = array<i32>} : memref<16x64xbf16, #tpu.memory_space<vmem>>, vector<16x64xbf16>,
    } else {
    }
    return
  }
  func.func @transform_0(%arg0: i32, %arg1: i32, %arg2: i32) -> (i32, i32) {
    %c0_i32 = arith.constant 0 : i32
    return %arg0, %arg2 : i32, i32
  }
  func.func @transform_1(%arg0: i32, %arg1: i32, %arg2: i32) -> (i32, i32) {
    %c0_i32 = arith.constant 0 : i32
    return %arg2, %arg1 : i32, i32
  }
  func.func @transform_2(%arg0: i32, %arg1: i32, %arg2: i32) -> (i32, i32) {
    %c0_i32 = arith.constant 0 : i32
    %c0_i32_0 = arith.constant 0 : i32
    return %c0_i32, %arg1 : i32, i32
  }
  func.func @transform_3(%arg0: i32, %arg1: i32, %arg2: i32) -> (i32, i32) {
    %c0_i32 = arith.constant 0 : i32
    return %arg0, %arg1 : i32, i32
  }
}

module attributes {stable_mosaic.version = 11 : i64} {
  func.func @_matmul_add_ln_kernel(%arg0: i32, %arg1: i32, %arg2: memref<16x64xbf16, #tpu.memory_space<vmem>>, %arg3: memref<64x32xbf16, #tpu.memory_space<vmem>>, %arg4: memref<1x32xf32, #tpu.memory_space<vmem>>, %arg5: memref<16x32xbf16, #tpu.memory_space<vmem>>, %arg6: memref<1x32xf32, #tpu.memory_space<vmem>>, %arg7: memref<1x32xf32, #tpu.memory_space<vmem>>, %arg8: memref<16x32xf32, #tpu.memory_space<vmem>>, %arg9: memref<16x32xf32, #tpu.memory_space<vmem>>) attributes {dimension_semantics = [#tpu.dimension_semantics<parallel>, #tpu.dimension_semantics<arbitrary>], iteration_bounds = array<i64: 1, 1>, scalar_prefetch = 0 : i64, scratch_operands = 1 : i64, tpu.core_type = #tpu.core_type<tc>, window_params = [{transform_indices = @transform_0, window_bounds = array<i64: 16, 64>}, {transform_indices = @transform_1, window_bounds = array<i64: 64, 32>}, {pipeline_mode = #tpu.pipeline_mode<synchronous>, transform_indices = @transform_2, window_bounds = array<i64: 1, 32>}, {transform_indices = @transform_3, window_bounds = array<i64: 16, 32>}, {pipeline_mode = #tpu.pipeline_mode<synchronous>, transform_indices = @transform_4, window_bounds = array<i64: 1, 32>}, {pipeline_mode = #tpu.pipeline_mode<synchronous>, transform_indices = @transform_5, window_bounds = array<i64: 1, 32>}, {transform_indices = @transform_6, window_bounds = array<i64: 16, 32>}]} {
    %c0_i32 = arith.constant 0 : i32
    %0 = arith.cmpi eq, %arg1, %c0_i32 : i32
    %1 = arith.extui %0 : i1 to i32
    %c0_i32_0 = arith.constant 0 : i32
    %2 = arith.cmpi ne, %1, %c0_i32_0 : i32
    scf.if %2 {
      %cst_10 = arith.constant 0.000000e+00 : f32
      %12 = vector.broadcast %cst_10 : f32 to vector<16x32xf32>
      %c0_11 = arith.constant 0 : index
      %c0_12 = arith.constant 0 : index
      %13 = vector.load %arg9[%c0_11, %c0_12] : memref<16x32xf32, #tpu.memory_space<vmem>>, vector<16x32xf32>
      tpu.vector_store %arg9[%c0_11, %c0_12], %12 {strides = array<i32>} : memref<16x32xf32, #tpu.memory_space<vmem>>, vector<16x32xf32>,
    } else {
    }
    %c0 = arith.constant 0 : index
    %c0_1 = arith.constant 0 : index
    %3 = vector.load %arg9[%c0, %c0_1] : memref<16x32xf32, #tpu.memory_space<vmem>>, vector<16x32xf32>
    %c0_2 = arith.constant 0 : index
    %c0_3 = arith.constant 0 : index
    %4 = vector.load %arg2[%c0_2, %c0_3] : memref<16x64xbf16, #tpu.memory_space<vmem>>, vector<16x64xbf16>
    %c0_4 = arith.constant 0 : index
    %c0_5 = arith.constant 0 : index
    %5 = vector.load %arg3[%c0_4, %c0_5] : memref<64x32xbf16, #tpu.memory_space<vmem>>, vector<64x32xbf16>
    %cst = arith.constant dense<0.000000e+00> : vector<16x32xf32>
    %6 = tpu.matmul %4, %5, %cst {dimension_numbers = #tpu.dot_dimension_numbers<[1], [0], [0], [1], [0, 0, 1, 1], [], []>} : vector<16x64xbf16>, vector<64x32xbf16>, vector<16x32xf32> -> vector<16x32xf32>
    %7 = arith.addf %3, %6 : vector<16x32xf32>
    %c0_6 = arith.constant 0 : index
    %c0_7 = arith.constant 0 : index
    %8 = vector.load %arg9[%c0_6, %c0_7] : memref<16x32xf32, #tpu.memory_space<vmem>>, vector<16x32xf32>
    tpu.vector_store %arg9[%c0_6, %c0_7], %7 {strides = array<i32>} : memref<16x32xf32, #tpu.memory_space<vmem>>, vector<16x32xf32>,
    %c0_i32_8 = arith.constant 0 : i32
    %9 = arith.cmpi eq, %arg1, %c0_i32_8 : i32
    %10 = arith.extui %9 : i1 to i32
    %c0_i32_9 = arith.constant 0 : i32
    %11 = arith.cmpi ne, %10, %c0_i32_9 : i32
    scf.if %11 {
      %c0_10 = arith.constant 0 : index
      %c0_11 = arith.constant 0 : index
      %12 = vector.load %arg9[%c0_10, %c0_11] : memref<16x32xf32, #tpu.memory_space<vmem>>, vector<16x32xf32>
      %c0_12 = arith.constant 0 : index
      %c0_13 = arith.constant 0 : index
      %13 = vector.load %arg4[%c0_12, %c0_13] : memref<1x32xf32, #tpu.memory_space<vmem>>, vector<1x32xf32>
      %14 = vector.broadcast %13 : vector<1x32xf32> to vector<16x32xf32>
      %15 = arith.addf %12, %14 : vector<16x32xf32>
      %c0_14 = arith.constant 0 : index
      %c0_15 = arith.constant 0 : index
      %16 = vector.load %arg5[%c0_14, %c0_15] : memref<16x32xbf16, #tpu.memory_space<vmem>>, vector<16x32xbf16>
      %17 = arith.extf %16 : vector<16x32xbf16> to vector<16x32xf32>
      %18 = arith.addf %15, %17 : vector<16x32xf32>
      %cst_16 = arith.constant dense<0.000000e+00> : vector<16xf32>
      %19 = vector.multi_reduction <add>, %18, %cst_16 [1] : vector<16x32xf32> to vector<16xf32>
      %20 = vector.shape_cast %19 : vector<16xf32> to vector<16x1xf32>
      %cst_17 = arith.constant 3.200000e+01 : f32
      %21 = vector.broadcast %cst_17 : f32 to vector<16x1xf32>
      %22 = arith.divf %20, %21 : vector<16x1xf32>
      %23 = vector.broadcast %22 : vector<16x1xf32> to vector<16x32xf32>
      %24 = arith.subf %18, %23 : vector<16x32xf32>
      %25 = arith.mulf %24, %24 : vector<16x32xf32>
      %cst_18 = arith.constant dense<0.000000e+00> : vector<16xf32>
      %26 = vector.multi_reduction <add>, %25, %cst_18 [1] : vector<16x32xf32> to vector<16xf32>
      %27 = vector.shape_cast %26 : vector<16xf32> to vector<16x1xf32>
      %cst_19 = arith.constant 3.200000e+01 : f32
      %28 = vector.broadcast %cst_19 : f32 to vector<16x1xf32>
      %29 = arith.divf %27, %28 : vector<16x1xf32>
      %cst_20 = arith.constant 9.99999974E-6 : f32
      %30 = vector.broadcast %cst_20 : f32 to vector<16x1xf32>
      %31 = arith.addf %29, %30 : vector<16x1xf32>
      %32 = math.rsqrt %31 : vector<16x1xf32>
      %33 = vector.broadcast %32 : vector<16x1xf32> to vector<16x32xf32>
      %34 = arith.mulf %24, %33 : vector<16x32xf32>
      %c0_21 = arith.constant 0 : index
      %c0_22 = arith.constant 0 : index
      %35 = vector.load %arg6[%c0_21, %c0_22] : memref<1x32xf32, #tpu.memory_space<vmem>>, vector<1x32xf32>
      %36 = vector.broadcast %35 : vector<1x32xf32> to vector<16x32xf32>
      %37 = arith.mulf %34, %36 : vector<16x32xf32>
      %c0_23 = arith.constant 0 : index
      %c0_24 = arith.constant 0 : index
      %38 = vector.load %arg7[%c0_23, %c0_24] : memref<1x32xf32, #tpu.memory_space<vmem>>, vector<1x32xf32>
      %39 = vector.broadcast %38 : vector<1x32xf32> to vector<16x32xf32>
      %40 = arith.addf %37, %39 : vector<16x32xf32>
      %c0_25 = arith.constant 0 : index
      %c0_26 = arith.constant 0 : index
      %41 = vector.load %arg8[%c0_25, %c0_26] : memref<16x32xf32, #tpu.memory_space<vmem>>, vector<16x32xf32>
      tpu.vector_store %arg8[%c0_25, %c0_26], %40 {strides = array<i32>} : memref<16x32xf32, #tpu.memory_space<vmem>>, vector<16x32xf32>,
    } else {
    }
    return
  }
  func.func @transform_0(%arg0: i32, %arg1: i32) -> (i32, i32) {
    %c0_i32 = arith.constant 0 : i32
    return %arg0, %arg1 : i32, i32
  }
  func.func @transform_1(%arg0: i32, %arg1: i32) -> (i32, i32) {
    %c0_i32 = arith.constant 0 : i32
    %c0_i32_0 = arith.constant 0 : i32
    return %arg1, %c0_i32 : i32, i32
  }
  func.func @transform_2(%arg0: i32, %arg1: i32) -> (i32, i32) {
    %c0_i32 = arith.constant 0 : i32
    %c0_i32_0 = arith.constant 0 : i32
    %c0_i32_1 = arith.constant 0 : i32
    return %c0_i32, %c0_i32_0 : i32, i32
  }
  func.func @transform_3(%arg0: i32, %arg1: i32) -> (i32, i32) {
    %c0_i32 = arith.constant 0 : i32
    %c0_i32_0 = arith.constant 0 : i32
    return %arg0, %c0_i32 : i32, i32
  }
  func.func @transform_4(%arg0: i32, %arg1: i32) -> (i32, i32) {
    %c0_i32 = arith.constant 0 : i32
    %c0_i32_0 = arith.constant 0 : i32
    %c0_i32_1 = arith.constant 0 : i32
    return %c0_i32, %c0_i32_0 : i32, i32
  }
  func.func @transform_5(%arg0: i32, %arg1: i32) -> (i32, i32) {
    %c0_i32 = arith.constant 0 : i32
    %c0_i32_0 = arith.constant 0 : i32
    %c0_i32_1 = arith.constant 0 : i32
    return %c0_i32, %c0_i32_0 : i32, i32
  }
  func.func @transform_6(%arg0: i32, %arg1: i32) -> (i32, i32) {
    %c0_i32 = arith.constant 0 : i32
    %c0_i32_0 = arith.constant 0 : i32
    return %arg0, %c0_i32 : i32, i32
  }
}

</mosaic_0001>

<bundles_post_ra>
// kernel: decoder_layer_forward.11
= control target key start
LH: loop header
LB: loop body
LE: loop exit
PB: predicated region body
PF: predicated region fallthrough
CT: control target
= control target key end

     0   :  { %vm19_vm0 = vcmask 523264   ;;  %v151_v0 = vmov 0.0   ;;  %vm152_vm1 = vmmov 0   ;;  %vm47_vm2 = vcmask 261120   ;;  %s195_s1 = inlined_call_operand.vmem [shape: bf16[32,64], index: 1, kind: input, shape index: {}]   ;;  %s196_s0 = inlined_call_operand.vmem [shape: bf16[16,32], index: 0, kind: input, shape index: {}]   ;;  %s197_s2 = inlined_call_operand.vmem [shape: f32[1,64], index: 2, kind: input, shape index: {}]   ;;  %s198_s3 = inlined_call_operand.vmem [shape: bf16[16,64], index: 3, kind: output, shape index: {}]  }
   0x1   :  { %138 = vmatprep.subr.bf16.mxu0 %v151_v0  ;;  %v148_v1 = vld [vmem:[%s195_s1 + $0x8] sm:$0xff]   ;;  %142 = vmatprep.mubr.msk.bf16.mxu0 %vm152_vm1, %v151_v0  ;;  %20 = vst.msk [vmem:[#allocation2] sm:$0xff] %vm19_vm0, %v151_v0  ;;  %21 = vst.msk [vmem:[#allocation2 + $0x8] sm:$0xff] %vm19_vm0, %v151_v0  ;;  %v149_v2 = vld [vmem:[%s195_s1] sm:$0xff]   ;;  %vm119_vm3 = vcmask 519168  }
   0x2   :  { %139 = vmatpush3.bf16.msra.mxu0 %v148_v1  ;;  %v150_v3 = vld [vmem:[%s196_s0] sm:$0xff]  }
   0x3   :  { %140 = vmatprep.subr.bf16.mxu0 %v151_v0  ;;  %v130_v12 = vld [vmem:[%s197_s2] ss:$0 sm:$0xff] }
   0x6   :  { %141 = vmatpush3.bf16.msra.mxu0 %v149_v2 }
   0x8   :  { %v22_v4 = vld [vmem:[#allocation2] sm:$0xff]  ;;  %v23_v8 = vld [vmem:[#allocation2 + $0x8] sm:$0xff] }
   0x9   :  { %143 = vmatmul.mubr.msk.bf16.vlgmr.msra.gmra.mxu0 %vm47_vm2, %v150_v3 }
  0xc9   :  { %v85_v5 = vpop.f32.mrf.mxu0 }
  0xca   :  { %v92_v6 = vadd.f32 %v85_v5, %v22_v4 }
  0xcb   :  { %v144_v7 = vpop.f32.mrf.mxu0 }
  0xcc   :  { %95 = vst.msk [vmem:[#allocation2] sm:$0xff] %vm19_vm0, %v92_v6 }
  0xcd   :  { %v88_v9 = vpop.f32.mrf.mxu0 }
  0xce   :  { %v93_v10 = vadd.f32 %v88_v9, %v23_v8 }
  0xcf   :  { %v145_v11 = vpop.f32.mrf.mxu0 }
  0xd0   :  { %96 = vst.msk [vmem:[#allocation2 + $0x8] sm:$0xff] %vm19_vm0, %v93_v10 }
  0xd3   :  { %v100_v13 = vld [vmem:[#allocation2] sm:$0xff] }
  0xd4   :  { %v109_v14 = vadd.f32 %v130_v12, %v100_v13 }
  0xd6   :  { %v133_v15 = vpack.c.bf16 %v109_v14, %v109_v14 }
  0xd7   :  { %v101_v16 = vld [vmem:[#allocation2 + $0x8] sm:$0xff] }
  0xd8   :  { %120 = vst.msk [vmem:[%s198_s3] sm:$0xf] %vm119_vm3, %v133_v15  ;;  %v110_v17 = vadd.f32 %v130_v12, %v101_v16 }
  0xda   :  { %v134_v18 = vpack.c.bf16 %v110_v17, %v110_v17 }
  0xdc   :  { %121 = vst.msk [vmem:[%s198_s3 + $0x4] sm:$0xf] %vm119_vm3, %v134_v18 }

// kernel: decoder_layer_forward.10
= control target key start
LH: loop header
LB: loop body
LE: loop exit
PB: predicated region body
PF: predicated region fallthrough
CT: control target
= control target key end

     0   :  { %vm19_vm0 = vcmask 261120   ;;  %v150_v0 = vmov 0.0   ;;  %vm151_vm1 = vmmov 0   ;;  %vm118_vm2 = vcmask 257024   ;;  %s195_s1 = inlined_call_operand.vmem [shape: bf16[32,32], index: 1, kind: input, shape index: {}]   ;;  %s196_s0 = inlined_call_operand.vmem [shape: bf16[16,32], index: 0, kind: input, shape index: {}]   ;;  %s197_s2 = inlined_call_operand.vmem [shape: f32[1,32], index: 2, kind: input, shape index: {}]   ;;  %s198_s3 = inlined_call_operand.vmem [shape: bf16[16,32], index: 3, kind: output, shape index: {}]  }
   0x1   :  { %137 = vmatprep.subr.bf16.mxu0 %v150_v0  ;;  %v147_v1 = vld [vmem:[%s195_s1 + $0x8] sm:$0xff]   ;;  %141 = vmatprep.mubr.msk.bf16.mxu0 %vm151_vm1, %v150_v0  ;;  %20 = vst.msk [vmem:[#allocation2] sm:$0xff] %vm19_vm0, %v150_v0  ;;  %21 = vst.msk [vmem:[#allocation2 + $0x8] sm:$0xff] %vm19_vm0, %v150_v0  ;;  %v148_v2 = vld [vmem:[%s195_s1] sm:$0xff]  }
   0x2   :  { %138 = vmatpush3.bf16.msra.mxu0 %v147_v1  ;;  %v149_v3 = vld [vmem:[%s196_s0] sm:$0xff]  }
   0x3   :  { %139 = vmatprep.subr.bf16.mxu0 %v150_v0  ;;  %v129_v12 = vld [vmem:[%s197_s2] ss:$0 sm:$0xff] }
   0x6   :  { %140 = vmatpush3.bf16.msra.mxu0 %v148_v2 }
   0x8   :  { %v22_v4 = vld [vmem:[#allocation2] sm:$0xff]  ;;  %v23_v8 = vld [vmem:[#allocation2 + $0x8] sm:$0xff] }
   0x9   :  { %142 = vmatmul.mubr.msk.bf16.vlgmr.msra.gmra.mxu0 %vm19_vm0, %v149_v3 }
  0xc9   :  { %v85_v5 = vpop.f32.mrf.mxu0 }
  0xca   :  { %v92_v6 = vadd.f32 %v85_v5, %v22_v4 }
  0xcb   :  { %v143_v7 = vpop.f32.mrf.mxu0 }
  0xcc   :  { %94 = vst.msk [vmem:[#allocation2] sm:$0xff] %vm19_vm0, %v92_v6 }
  0xcd   :  { %v88_v9 = vpop.f32.mrf.mxu0 }
  0xce   :  { %v93_v10 = vadd.f32 %v88_v9, %v23_v8 }
  0xcf   :  { %v144_v11 = vpop.f32.mrf.mxu0 }
  0xd0   :  { %95 = vst.msk [vmem:[#allocation2 + $0x8] sm:$0xff] %vm19_vm0, %v93_v10 }
  0xd3   :  { %v99_v13 = vld [vmem:[#allocation2] sm:$0xff] }
  0xd4   :  { %v108_v14 = vadd.f32 %v129_v12, %v99_v13 }
  0xd6   :  { %v132_v15 = vpack.c.bf16 %v108_v14, %v108_v14 }
  0xd7   :  { %v100_v16 = vld [vmem:[#allocation2 + $0x8] sm:$0xff] }
  0xd8   :  { %119 = vst.msk [vmem:[%s198_s3] sm:$0xf] %vm118_vm2, %v132_v15  ;;  %v109_v17 = vadd.f32 %v129_v12, %v100_v16 }
  0xda   :  { %v133_v18 = vpack.c.bf16 %v109_v17, %v109_v17 }
  0xdc   :  { %120 = vst.msk [vmem:[%s198_s3 + $0x4] sm:$0xf] %vm118_vm2, %v133_v18 }

// kernel: decoder_layer_forward.13
= control target key start
LH: loop header
LB: loop body
LE: loop exit
PB: predicated region body
PF: predicated region fallthrough
CT: control target
= control target key end

     0   :  { %vm28_vm0 = vcmask 261120   ;;  %v220_v0 = vmov 0.0   ;;  %vm221_vm1 = vmmov 0   ;;  %vm178_vm2 = vcmask 257024   ;;  %s293_s1 = inlined_call_operand.vmem [shape: bf16[32,32], index: 1, kind: input, shape index: {}]   ;;  %s294_s0 = inlined_call_operand.vmem [shape: bf16[16,32], index: 0, kind: input, shape index: {}]   ;;  %s295_s3 = inlined_call_operand.vmem [shape: bf16[16,32], index: 3, kind: input, shape index: {}]   ;;  %s296_s2 = inlined_call_operand.vmem [shape: f32[1,32], index: 2, kind: input, shape index: {}]   ;;  %s297_s4 = inlined_call_operand.vmem [shape: f32[1,32], index: 4, kind: input, shape index: {}]   ;;  %s298_s5 = inlined_call_operand.vmem [shape: f32[1,32], index: 5, kind: input, shape index: {}]   ;;  %s299_s6 = inlined_call_operand.vmem [shape: bf16[16,32], index: 6, kind: output, shape index: {}]  }
   0x1   :  { %203 = vmatprep.subr.bf16.mxu0 %v220_v0  ;;  %v213_v1 = vld [vmem:[%s293_s1 + $0x8] sm:$0xff]   ;;  %207 = vmatprep.mubr.msk.bf16.mxu0 %vm221_vm1, %v220_v0  ;;  %29 = vst.msk [vmem:[#allocation2] sm:$0xff] %vm28_vm0, %v220_v0  ;;  %30 = vst.msk [vmem:[#allocation2 + $0x8] sm:$0xff] %vm28_vm0, %v220_v0  ;;  %v214_v2 = vld [vmem:[%s293_s1] sm:$0xff]  }
   0x2   :  { %204 = vmatpush3.bf16.msra.mxu0 %v213_v1  ;;  %v215_v3 = vld [vmem:[%s294_s0] sm:$0xff]  }
   0x3   :  { %205 = vmatprep.subr.bf16.mxu0 %v220_v0  ;;  %v197_v12 = vld [vmem:[%s295_s3] sm:$0xff]  }
   0x4   :  { %v189_v13 = vld [vmem:[%s296_s2] ss:$0 sm:$0xff]  ;;  %v198_v14 = vunpack.c.l.bf16 %v197_v12  ;;  %v199_v18 = vunpack.c.h.bf16 %v197_v12 }
   0x5   :  { %v190_v41 = vld [vmem:[%s297_s4] ss:$0 sm:$0xff] }
   0x6   :  { %206 = vmatpush3.bf16.msra.mxu0 %v214_v2  ;;  %v191_v43 = vld [vmem:[%s298_s5] ss:$0 sm:$0xff] }
   0x8   :  { %v31_v4 = vld [vmem:[#allocation2] sm:$0xff]  ;;  %v32_v8 = vld [vmem:[#allocation2 + $0x8] sm:$0xff] }
   0x9   :  { %208 = vmatmul.mubr.msk.bf16.vlgmr.msra.gmra.mxu0 %vm28_vm0, %v215_v3 }
  0xc9   :  { %v94_v5 = vpop.f32.mrf.mxu0 }
  0xca   :  { %v101_v6 = vadd.f32 %v94_v5, %v31_v4 }
  0xcb   :  { %v209_v7 = vpop.f32.mrf.mxu0 }
  0xcc   :  { %103 = vst.msk [vmem:[#allocation2] sm:$0xff] %vm28_vm0, %v101_v6 }
  0xcd   :  { %v97_v9 = vpop.f32.mrf.mxu0 }
  0xce   :  { %v102_v10 = vadd.f32 %v97_v9, %v32_v8 }
  0xcf   :  { %v210_v11 = vpop.f32.mrf.mxu0 }
  0xd0   :  { %104 = vst.msk [vmem:[#allocation2 + $0x8] sm:$0xff] %vm28_vm0, %v102_v10 }
  0xd3   :  { %v108_v15 = vld [vmem:[#allocation2] sm:$0xff] }
  0xd4   :  { %v117_v16 = vadd.f32 %v189_v13, %v108_v15 }
  0xd6   :  { %v123_v17 = vadd.f32 %v198_v14, %v117_v16 }
  0xd7   :  { %v109_v19 = vld [vmem:[#allocation2 + $0x8] sm:$0xff] }
  0xd8   :  { %v125_v20 = vsel %vm28_vm0, %v123_v17, 0.0  ;;  %v118_v21 = vadd.f32 %v189_v13, %v109_v19 }
  0xd9   :  { %126 = vadd.xlane.f32.xlu0 %v125_v20 }
  0xda   :  { %v124_v22 = vadd.f32 %v199_v18, %v118_v21 }
  0xdc   :  { %v128_v23 = vsel %vm28_vm0, %v124_v22, 0.0 }
  0xdd   :  { %129 = vadd.xlane.f32.xlu0 %v128_v23 }
 0x162   :  { %v127_v24 = vpop.xlane.xlu0 %126 }
 0x163   :  { %v132_v25 = vmul.f32 0.03125, %v127_v24 }
 0x165   :  { %v134_v26 = vsub.f32 %v123_v17, %v132_v25 }
 0x166   :  { %v130_v27 = vpop.xlane.xlu0 %129 }
 0x167   :  { %v133_v28 = vmul.f32 0.03125, %v130_v27  ;;  %v136_v29 = vmul.f32 %v134_v26, %v134_v26 }
 0x169   :  { %v135_v30 = vsub.f32 %v124_v22, %v133_v28  ;;  %v138_v31 = vsel %vm28_vm0, %v136_v29, 0.0 }
 0x16a   :  { %139 = vadd.xlane.f32.xlu1 %v138_v31 }
 0x16b   :  { %v137_v32 = vmul.f32 %v135_v30, %v135_v30 }
 0x16d   :  { %v141_v33 = vsel %vm28_vm0, %v137_v32, 0.0 }
 0x16e   :  { %142 = vadd.xlane.f32.xlu1 %v141_v33 }
 0x1f3   :  { %v140_v34 = vpop.xlane.xlu1 %139 }
 0x1f4   :  { %v144_v35 = vmul.f32 0.03125, %v140_v34 }
 0x1f6   :  { %v146_v36 = vadd.f32 1e-05, %v144_v35 }
 0x1f7   :  { %v143_v37 = vpop.xlane.xlu1 %142 }
 0x1f8   :  { %216 = vrsqrt.f32 %v146_v36  ;;  %v145_v38 = vmul.f32 0.03125, %v143_v37 }
 0x1fa   :  { %v147_v39 = vadd.f32 1e-05, %v145_v38 }
 0x1fc   :  { %218 = vrsqrt.f32 %v147_v39 }
 0x205   :  { %v217_v40 = vpop.eup %216 }
 0x206   :  { %v150_v42 = vmul.f32 %v217_v40, %v134_v26 }
 0x208   :  { %v159_v44 = vmul.f32 %v190_v41, %v150_v42 }
 0x209   :  { %v219_v45 = vpop.eup %218 }
 0x20a   :  { %v168_v46 = vadd.f32 %v191_v43, %v159_v44  ;;  %v151_v47 = vmul.f32 %v219_v45, %v135_v30 }
 0x20c   :  { %v194_v48 = vpack.c.bf16 %v168_v46, %v168_v46  ;;  %v160_v49 = vmul.f32 %v190_v41, %v151_v47 }
 0x20e   :  { %179 = vst.msk [vmem:[%s299_s6] sm:$0xf] %vm178_vm2, %v194_v48  ;;  %v169_v50 = vadd.f32 %v191_v43, %v160_v49 }
 0x210   :  { %v195_v51 = vpack.c.bf16 %v169_v50, %v169_v50 }
 0x212   :  { %180 = vst.msk [vmem:[%s299_s6 + $0x4] sm:$0xf] %vm178_vm2, %v195_v51 }

// kernel: decoder_layer_forward.12
= control target key start
LH: loop header
LB: loop body
LE: loop exit
PB: predicated region body
PF: predicated region fallthrough
CT: control target
= control target key end

     0   :  { %s1121_s9 = smov 0   ;;  %s1123_s10 = smov 0   ;;  %s1284_s0 = inlined_call_operand.vmem [shape: bf16[2,8,32], index: 0, kind: input, shape index: {}]   ;;  %s1285_s1 = inlined_call_operand.vmem [shape: bf16[2,8,64], index: 1, kind: input, shape index: {}]   ;;  %s1286_s2 = inlined_call_operand.vmem [shape: bf16[2,8,32], index: 2, kind: output, shape index: {}]  }
   0x1   :  { %s1125_s11 = smov 0  }
   0x2 LB: > { %s31_s12 = sadd.s32 1, %s1086_s10  ;;  %p923_p0 = scmp.ge.s32.totalorder %s1090_s11, 1  ;;  %s1090_s11 = sphi %s1125_s11, %s12_s11   ;;  %s1086_s10 = sphi %s1123_s10, %s1288_s10   ;;  %s1082_s9 = sphi %s1121_s9, %s1287_s9  }
   0x3   : > { %p33_p1 = scmp.ge.s32.totalorder %s31_s12, 2  ;;  %p151_p2 = scmp.lt.s32.totalorder %s1090_s11, 3 }
   0x5   : > { %s1290_s12 = smov (%p33_p1, %s31_s12), 0  ;;  %p152_p3 = pnand %p923_p0, %p151_p2 }
   0x6   : > { %p184_p4 = scmp.lt.s32.totalorder (!%p152_p3), %s1082_s9, 1  ;;  %s1096_s20 = smov (!%p152_p3), 96  }
   0x7   : > { %155 = sbr.rel (%p152_p3) target bundleno = 1410 (0x582), region = 28  ;;  %s1097_s21 = smov (!%p152_p3), 120  }
   0x8   : > { %s1098_s22 = smov (!%p152_p3), 112   ;;  %s1099_s23 = smov (!%p152_p3), 104  }
   0x9   : > { %s1100_s24 = smov (!%p152_p3), 88   ;;  %s1101_s25 = smov (!%p152_p3), 80  }
   0xa   : > { %s1102_s26 = smov (!%p152_p3), 72   ;;  %s1103_s27 = smov (!%p152_p3), 8  }
   0xb   : > { %s1104_s28 = smov (!%p152_p3), 16   ;;  %s1105_s29 = smov (!%p152_p3), 24  }
   0xc   : > { %vm219_vm0 = vcmask 64512   ;;  %v1092_v0 = vmov 0.0   ;;  %vm1093_vm1 = vmmov 0   ;;  %s1292_s9 = smov (!%p184_p4, %s1082_s9), 1  ;;  %vm210_vm2 = vcmask 7168  }
   0xd   : > { %955 = vmatprep.subr.bf16.mxu0 %v1092_v0  ;;  %220 = vst.msk [vmem:[#allocation4] sm:$0xff] %vm219_vm0, %v1092_v0  ;;  %221 = vst.msk [vmem:[#allocation4 + $0x8] sm:$0xff] %vm219_vm0, %v1092_v0  ;;  %957 = vmatprep.mubr.msk.bf16.mxu0 %vm1093_vm1, %v1092_v0  ;;  %s1153_s13 = sshll.u32 %s1292_s9, 2  ;;  %v1094_v4 = vmov -inf   ;;  %v1095_v10 = vmov 0   ;;  %vm313_vm3 = vcmask 1043456  }
   0xe   : > { %222 = vst.msk [vmem:[#allocation4 + $0x10] sm:$0xff] %vm219_vm0, %v1092_v0  ;;  %223 = vst.msk [vmem:[#allocation4 + $0x18] sm:$0xff] %vm219_vm0, %v1092_v0  ;;  %961 = vmatprep.subr.bf16.mxu1 %v1092_v0  ;;  %963 = vmatprep.mubr.msk.bf16.mxu1 %vm1093_vm1, %v1092_v0  ;;  %s197_s16 = scalar_lea.vmem %s1285_s1, %s1153_s13  ;;  %s190_s19 = scalar_lea.vmem %s1284_s0, %s1153_s13  ;;  %vm820_vm4 = vcmask 130048   ;;  %vm822_vm5 = vcmask 195584   ;;  %vm825_vm6 = vcmask 257024  }
   0xf   : > { %v225_v1 = vld [vmem:[%s197_s16] sm:$0xf]  ;;  %211 = vst.msk [vmem:[#allocation2] sm:$0xff] %vm210_vm2, %v1094_v4  ;;  %212 = vst.msk [vmem:[#allocation2 + $0x8] sm:$0xff] %vm210_vm2, %v1094_v4  ;;  %1041 = vset.pattern.permute.xlu0 %v1095_v10  ;;  %1042 = vset.pattern.permute.xlu1 %v1095_v10  ;;  %s204_s4 = scalar_lea.vmem %s1286_s2, %s1153_s13 }
  0x10   : > { %v231_v2 = vsel %vm219_vm0, %v225_v1, 0  ;;  %v224_v3 = vld [vmem:[%s190_s19] sm:$0xf]  ;;  %213 = vst.msk [vmem:[#allocation2 + $0x10] sm:$0xff] %vm210_vm2, %v1094_v4  ;;  %214 = vst.msk [vmem:[#allocation2 + $0x18] sm:$0xff] %vm210_vm2, %v1094_v4  ;;  %v1181_v11 = vcombine.low %v225_v1, %v225_v1 }
  0x11   : > { %956 = vmatpush3.bf16.xpose.msra.mxu0 %v231_v2  ;;  %215 = vst.msk [vmem:[#allocation3] sm:$0xff] %vm210_vm2, %v1092_v0  ;;  %216 = vst.msk [vmem:[#allocation3 + $0x8] sm:$0xff] %vm210_vm2, %v1092_v0  ;;  %v930_v12 = vcombine.low %v224_v3, %v224_v3 }
  0x12   : > { %973 = vmatprep.subr.bf16.mxu0 %v1092_v0  ;;  %217 = vst.msk [vmem:[#allocation3 + $0x10] sm:$0xff] %vm210_vm2, %v1092_v0  ;;  %218 = vst.msk [vmem:[#allocation3 + $0x18] sm:$0xff] %vm210_vm2, %v1092_v0  ;;  %308 = vrot.lane.b32.xlu1 %v1181_v11, %s1096_s20 }
  0x16   : > { %365 = vrot.lane.b32.xlu1 %v1181_v11, %s1097_s21  ;;  %v1187_v13 = vld [vmem:[#allocation2] sm:$0xff]  ;;  %v1223_v52 = vld [vmem:[#allocation2 + $0x8] sm:$0xff] }
  0x17   : > { %v549_v56 = vld [vmem:[#allocation2 + $0x10] sm:$0xff]  ;;  %v684_v60 = vld [vmem:[#allocation2 + $0x18] sm:$0xff] }
  0x18   : > { %958 = vmatmul.mubr.msk.bf16.vlgmr.msra.gmra.mxu0 %vm219_vm0, %v224_v3 }
  0x19   : > { %975 = vmatprep.mubr.msk.bf16.mxu0 %vm1093_vm1, %v1092_v0 }
  0x1a   : > { %363 = vrot.lane.b32.xlu1 %v930_v12, %s1097_s21 }
  0x1e   : > { %500 = vrot.lane.b32.xlu1 %v1181_v11, %s1098_s22 }
  0x22   : > { %498 = vrot.lane.b32.xlu1 %v930_v12, %s1098_s22 }
  0x26   : > { %635 = vrot.lane.b32.xlu1 %v1181_v11, %s1099_s23 }
  0x2a   : > { %633 = vrot.lane.b32.xlu1 %v930_v12, %s1099_s23 }
  0x84   : > { %v309_v17 = vpop.permute.xlu1 %308 }
  0x85   : > { %v315_v18 = vsel %vm313_vm3, %v309_v17, 0 }
  0x86   : > { %962 = vmatpush3.bf16.msra.mxu1 %v315_v18 }
  0x87   : > { %967 = vmatprep.subr.bf16.mxu1 %v1092_v0 }
  0x88   : > { %v366_v22 = vpop.permute.xlu1 %365 }
  0x89   : > { %v371_v25 = vsel %vm219_vm0, %v366_v22, 0 }
  0x8c   : > { %v364_v23 = vpop.permute.xlu1 %363 }
  0x90   : > { %v501_v27 = vpop.permute.xlu1 %500 }
  0x91   : > { %v506_v29 = vsel %vm219_vm0, %v501_v27, 0 }
  0x94   : > { %v499_v28 = vpop.permute.xlu1 %498 }
  0x98   : > { %v636_v30 = vpop.permute.xlu1 %635 }
  0x99   : > { %v641_v31 = vsel %vm219_vm0, %v636_v30, 0 }
  0x9c   : > { %v634_v32 = vpop.permute.xlu1 %633 }
  0xd8   : > { %v267_v5 = vpop.f32.mrf.mxu0 }
  0xd9   : > { %v274_v6 = vsel %vm219_vm0, %v267_v5, -inf }
  0xda   : > { %275 = vmax.xlane.f32.xlu0 %v274_v6  ;;  %v959_v7 = vpop.f32.mrf.mxu0 }
  0xdc   : > { %v270_v8 = vpop.f32.mrf.mxu0 }
  0xde   : > { %v960_v9 = vpop.f32.mrf.mxu0 }
 0x163   : > { %v276_v14 = vpop.xlane.xlu0 %275 }
 0x164   : > { %v1190_v15 = vmax.f32 %v1187_v13, %v276_v14 }
 0x166   : > { %v278_v16 = vsub.f32 %v1187_v13, %v1190_v15  ;;  %359 = vst.msk [vmem:[#allocation2] sm:$0xff] %vm210_vm2, %v1190_v15  ;;  %283 = vperm.xlu0 %1041, %v1190_v15  }
 0x168   : > { %v279_v12 = vmul.f32 1.442695, %v278_v16 }
 0x1e1   : > { %v284_v19 = vpop.permute.xlu0 %283 }
 0x1e2   : > { %v286_v20 = vsub.f32 %v267_v5, %v284_v19 }
 0x1e4   : > { %v287_v21 = vmul.f32 1.442695, %v286_v20 }
 0x1e6   : > { %1044 = vpow2.f32 %v287_v21 }
 0x1f3   : > { %v1199_v24 = vpop.eup %1044 }
 0x1f4   : > { %v304_v26 = vpack.c.bf16 %v1199_v24, %v1199_v24  ;;  %v291_v1 = vsel %vm219_vm0, %v1199_v24, 0.0 }
 0x1f6   : > { %964 = vmatmul.mubr.msk.bf16.vlgmr.msra.gmra.mxu1 %vm219_vm0, %v304_v26 }
 0x1f7   : > { %968 = vmatpush3.bf16.xpose.msra.mxu1 %v371_v25  ;;  %969 = vmatprep.mubr.msk.bf16.mxu1 %vm1093_vm1, %v1092_v0 }
 0x1f8   : > { %979 = vmatprep.subr.bf16.mxu1 %v1092_v0 }
 0x1fe   : > { %970 = vmatmul.mubr.msk.bf16.vlgmr.msra.gmra.mxu1 %vm219_vm0, %v364_v23 }
 0x1ff   : > { %980 = vmatpush3.bf16.xpose.msra.mxu1 %v506_v29  ;;  %981 = vmatprep.mubr.msk.bf16.mxu1 %vm1093_vm1, %v1092_v0 }
 0x200   : > { %991 = vmatprep.subr.bf16.mxu1 %v1092_v0 }
 0x206   : > { %982 = vmatmul.mubr.msk.bf16.vlgmr.msra.gmra.mxu1 %vm219_vm0, %v499_v28 }
 0x207   : > { %992 = vmatpush3.bf16.xpose.msra.mxu1 %v641_v31  ;;  %993 = vmatprep.mubr.msk.bf16.mxu1 %vm1093_vm1, %v1092_v0 }
 0x20e   : > { %994 = vmatmul.mubr.msk.bf16.vlgmr.msra.gmra.mxu1 %vm219_vm0, %v634_v32 }
 0x2b6   : > { %v1218_v33 = vpop.f32.mrf.mxu1 }
 0x2b8   : > { %v965_v34 = vpop.f32.mrf.mxu1 }
 0x2b9   : > { %v289_v34 = vld [vmem:[#allocation3] sm:$0xff] }
 0x2ba   : > { %v354_v35 = vpop.f32.mrf.mxu1 }
 0x2bc   : > { %v966_v36 = vpop.f32.mrf.mxu1 }
 0x2be   : > { %v407_v37 = vpop.f32.mrf.mxu1 }
 0x2bf   : > { %v415_v38 = vsel %vm219_vm0, %v407_v37, -inf }
 0x2c0   : > { %416 = vmax.xlane.f32.xlu1 %v415_v38  ;;  %v971_v39 = vpop.f32.mrf.mxu1 }
 0x2c2   : > { %v410_v40 = vpop.f32.mrf.mxu1 }
 0x2c3   : > { %v431_v40 = vld [vmem:[#allocation3 + $0x8] sm:$0xff] }
 0x2c4   : > { %v972_v41 = vpop.f32.mrf.mxu1 }
 0x2c6   : > { %v542_v42 = vpop.f32.mrf.mxu1 }
 0x2c7   : > { %v550_v43 = vsel %vm219_vm0, %v542_v42, -inf }
 0x2c8   : > { %551 = vmax.xlane.f32.xlu0 %v550_v43  ;;  %v983_v44 = vpop.f32.mrf.mxu1 }
 0x2c9   : > { %v297_v44 = vld [vmem:[#allocation4] sm:$0xff] }
 0x2ca   : > { %v545_v45 = vpop.f32.mrf.mxu1 }
 0x2cc   : > { %v984_v46 = vpop.f32.mrf.mxu1 }
 0x2cd   : > { %v566_v46 = vld [vmem:[#allocation3 + $0x10] sm:$0xff] }
 0x2ce   : > { %v677_v47 = vpop.f32.mrf.mxu1 }
 0x2cf   : > { %v685_v48 = vsel %vm219_vm0, %v677_v47, -inf }
 0x2d0   : > { %686 = vmax.xlane.f32.xlu1 %v685_v48  ;;  %v995_v49 = vpop.f32.mrf.mxu1 }
 0x2d2   : > { %v680_v50 = vpop.f32.mrf.mxu1 }
 0x2d4   : > { %v996_v51 = vpop.f32.mrf.mxu1 }
 0x349   : > { %v417_v53 = vpop.xlane.xlu1 %416 }
 0x34a   : > { %v1226_v54 = vmax.f32 %v1223_v52, %v417_v53  ;;  %v701_v53 = vld [vmem:[#allocation3 + $0x18] sm:$0xff] }
 0x34c   : > { %v419_v55 = vsub.f32 %v1223_v52, %v1226_v54  ;;  %497 = vst.msk [vmem:[#allocation2 + $0x8] sm:$0xff] %vm210_vm2, %v1226_v54  ;;  %424 = vperm.xlu1 %1042, %v1226_v54  }
 0x34e   : > { %v420_v31 = vmul.f32 1.442695, %v419_v55 }
 0x351   : > { %v552_v57 = vpop.xlane.xlu0 %551 }
 0x352   : > { %v553_v58 = vmax.f32 %v549_v56, %v552_v57 }
 0x354   : > { %v554_v59 = vsub.f32 %v549_v56, %v553_v58  ;;  %632 = vst.msk [vmem:[#allocation2 + $0x10] sm:$0xff] %vm210_vm2, %v553_v58  ;;  %559 = vperm.xlu0 %1041, %v553_v58  }
 0x356   : > { %v555_v19 = vmul.f32 1.442695, %v554_v59 }
 0x359   : > { %v687_v61 = vpop.xlane.xlu1 %686 }
 0x35a   : > { %v688_v62 = vmax.f32 %v684_v60, %v687_v61  ;;  %v439_v61 = vld [vmem:[#allocation4 + $0x8] sm:$0xff] }
 0x35c   : > { %v689_v63 = vsub.f32 %v684_v60, %v688_v62  ;;  %767 = vst.msk [vmem:[#allocation2 + $0x18] sm:$0xff] %vm210_vm2, %v688_v62  ;;  %694 = vperm.xlu1 %1042, %v688_v62  }
 0x35e   : > { %v690_v16 = vmul.f32 1.442695, %v689_v63 }
 0x360   : > { %447 = vrot.lane.b32.xlu1 %v1181_v11, %s1100_s24 }
 0x364   : > { %582 = vrot.lane.b32.xlu1 %v1181_v11, %s1101_s25 }
 0x368   : > { %717 = vrot.lane.b32.xlu1 %v1181_v11, %s1102_s26 }
 0x373   : > { %292 = vadd.xlane.f32.xlu0 %v291_v1 }
 0x3c7   : > { %v425_v2 = vpop.permute.xlu1 %424 }
 0x3c8   : > { %v427_v3 = vsub.f32 %v407_v37, %v425_v2 }
 0x3ca   : > { %v428_v4 = vmul.f32 1.442695, %v427_v3 }
 0x3cc   : > { %1046 = vpow2.f32 %v428_v4  ;;  %v574_v4 = vld [vmem:[#allocation4 + $0x10] sm:$0xff] }
 0x3cf   : > { %v560_v5 = vpop.permute.xlu0 %559 }
 0x3d0   : > { %v562_v6 = vsub.f32 %v542_v42, %v560_v5 }
 0x3d2   : > { %v563_v7 = vmul.f32 1.442695, %v562_v6 }
 0x3d4   : > { %1048 = vpow2.f32 %v563_v7 }
 0x3d7   : > { %v695_v8 = vpop.permute.xlu1 %694 }
 0x3d8   : > { %v697_v9 = vsub.f32 %v677_v47, %v695_v8 }
 0x3d9   : > { %v1047_v10 = vpop.eup %1046 }
 0x3da   : > { %v698_v11 = vmul.f32 1.442695, %v697_v9  ;;  %v433_v14 = vsel %vm219_vm0, %v1047_v10, 0.0  ;;  %v446_v20 = vpack.c.bf16 %v1047_v10, %v1047_v10 }
 0x3db   : > { %434 = vadd.xlane.f32.xlu1 %v433_v14  ;;  %v448_v17 = vpop.permute.xlu1 %447 }
 0x3dc   : > { %1050 = vpow2.f32 %v698_v11  ;;  %v453_v18 = vsel %vm313_vm3, %v448_v17, 0  ;;  %v709_v11 = vld [vmem:[#allocation4 + $0x18] sm:$0xff] }
 0x3dd   : > { %974 = vmatpush3.bf16.msra.mxu0 %v453_v18  ;;  %1052 = vpow2.f32 %v279_v12 }
 0x3de   : > { %985 = vmatprep.subr.bf16.mxu0 %v1092_v0  ;;  %1054 = vpow2.f32 %v555_v19 }
 0x3df   : > { %v583_v21 = vpop.permute.xlu1 %582  ;;  %1056 = vpow2.f32 %v690_v16 }
 0x3e0   : > { %976 = vmatmul.mubr.msk.bf16.vlgmr.msra.gmra.mxu0 %vm219_vm0, %v446_v20  ;;  %v588_v13 = vsel %vm313_vm3, %v583_v21, 0  ;;  %1058 = vpow2.f32 %v420_v31 }
 0x3e1   : > { %v1049_v15 = vpop.eup %1048  ;;  %986 = vmatpush3.bf16.msra.mxu0 %v588_v13  ;;  %987 = vmatprep.mubr.msk.bf16.mxu0 %vm1093_vm1, %v1092_v0 }
 0x3e2   : > { %v568_v22 = vsel %vm219_vm0, %v1049_v15, 0.0  ;;  %997 = vmatprep.subr.bf16.mxu0 %v1092_v0  ;;  %v581_v24 = vpack.c.bf16 %v1049_v15, %v1049_v15 }
 0x3e3   : > { %569 = vadd.xlane.f32.xlu0 %v568_v22  ;;  %v718_v23 = vpop.permute.xlu1 %717 }
 0x3e4   : > { %v723_v25 = vsel %vm313_vm3, %v718_v23, 0 }
 0x3e8   : > { %988 = vmatmul.mubr.msk.bf16.vlgmr.msra.gmra.mxu0 %vm219_vm0, %v581_v24 }
 0x3e9   : > { %v1051_v26 = vpop.eup %1050  ;;  %998 = vmatpush3.bf16.msra.mxu0 %v723_v25  ;;  %999 = vmatprep.mubr.msk.bf16.mxu0 %vm1093_vm1, %v1092_v0 }
 0x3ea   : > { %v703_v27 = vsel %vm219_vm0, %v1051_v26, 0.0  ;;  %v1053_v28 = vpop.eup %1052  ;;  %v716_v29 = vpack.c.bf16 %v1051_v26, %v1051_v26 }
 0x3eb   : > { %704 = vadd.xlane.f32.xlu0 %v703_v27  ;;  %v1055_v30 = vpop.eup %1054  ;;  %v290_v35 = vmul.f32 %v1053_v28, %v289_v34 }
 0x3ec   : > { %300 = vperm.xlu1 %1042, %v1053_v28   ;;  %v1057_v32 = vpop.eup %1056  ;;  %v567_v49 = vmul.f32 %v1055_v30, %v566_v46 }
 0x3ed   : > { %v1059_v37 = vpop.eup %1058  ;;  %v702_v54 = vmul.f32 %v1057_v32, %v701_v53 }
 0x3ee   : > { %v432_v41 = vmul.f32 %v1059_v37, %v431_v40 }
 0x3f0   : > { %1000 = vmatmul.mubr.msk.bf16.vlgmr.msra.gmra.mxu0 %vm219_vm0, %v716_v29  ;;  %577 = vperm.xlu1 %1042, %v1055_v30  }
 0x3f4   : > { %712 = vperm.xlu1 %1042, %v1057_v32  }
 0x3fc   : > { %v293_v0 = vpop.xlane.xlu0 %292 }
 0x3fd   : > { %v294_v36 = vadd.f32 %v293_v0, %v290_v35 }
 0x3ff   : > { %296 = vst.msk [vmem:[#allocation3] sm:$0xff] %vm210_vm2, %v294_v36 }
 0x401   : > { %442 = vperm.xlu0 %1041, %v1059_v37  }
 0x406   : > { %v771_v38 = vld [vmem:[#allocation3] sm:$0xff] }
 0x407   : > { %1060 = vrcp.f32 %v771_v38 }
 0x414   : > { %v1061_v39 = vpop.eup %1060 }
 0x415   : > { %776 = vperm.xlu0 %1041, %v1061_v39  }
 0x464   : > { %v435_v42 = vpop.xlane.xlu1 %434 }
 0x465   : > { %v436_v43 = vadd.f32 %v435_v42, %v432_v41 }
 0x467   : > { %437 = vst.msk [vmem:[#allocation3 + $0x8] sm:$0xff] %vm210_vm2, %v436_v43 }
 0x468   : > { %v301_v45 = vpop.permute.xlu1 %300 }
 0x469   : > { %v303_v47 = vmul.f32 %v301_v45, %v297_v44 }
 0x46b   : > { %v357_v48 = vadd.f32 %v1218_v33, %v303_v47 }
 0x46c   : > { %v570_v50 = vpop.xlane.xlu0 %569  ;;  %v578_v5 = vpop.permute.xlu1 %577 }
 0x46d   : > { %358 = vst.msk [vmem:[#allocation4] sm:$0xff] %vm219_vm0, %v357_v48  ;;  %v571_v51 = vadd.f32 %v570_v50, %v567_v49  ;;  %v580_v8 = vmul.f32 %v578_v5, %v574_v4 }
 0x46e   : > { %v780_v52 = vld [vmem:[#allocation3 + $0x8] sm:$0xff] }
 0x46f   : > { %572 = vst.msk [vmem:[#allocation3 + $0x10] sm:$0xff] %vm210_vm2, %v571_v51  ;;  %1062 = vrcp.f32 %v780_v52 }
 0x470   : > { %v713_v14 = vpop.permute.xlu1 %712 }
 0x471   : > { %v715_v19 = vmul.f32 %v713_v14, %v709_v11 }
 0x474   : > { %v705_v55 = vpop.xlane.xlu0 %704  ;;  %v773_v32 = vld [vmem:[#allocation4] sm:$0xff] }
 0x475   : > { %v706_v56 = vadd.f32 %v705_v55, %v702_v54 }
 0x476   : > { %v789_v57 = vld [vmem:[#allocation3 + $0x10] sm:$0xff] }
 0x477   : > { %707 = vst.msk [vmem:[#allocation3 + $0x18] sm:$0xff] %vm210_vm2, %v706_v56  ;;  %1064 = vrcp.f32 %v789_v57 }
 0x47c   : > { %v1063_v58 = vpop.eup %1062  ;;  %v443_v62 = vpop.permute.xlu0 %442 }
 0x47d   : > { %785 = vperm.xlu1 %1042, %v1063_v58   ;;  %v445_v63 = vmul.f32 %v443_v62, %v439_v61 }
 0x47e   : > { %v798_v33 = vld [vmem:[#allocation3 + $0x18] sm:$0xff] }
 0x47f   : > { %1066 = vrcp.f32 %v798_v33 }
 0x484   : > { %v1065_v59 = vpop.eup %1064 }
 0x485   : > { %794 = vperm.xlu0 %1041, %v1065_v59  }
 0x48c   : > { %v1067_v60 = vpop.eup %1066 }
 0x48d   : > { %803 = vperm.xlu1 %1042, %v1067_v60  }
 0x490   : > { %v777_v25 = vpop.permute.xlu0 %776 }
 0x491   : > { %v779_v35 = vmul.f32 %v777_v25, %v773_v32 }
 0x4a0   : > { %v489_v1 = vpop.f32.mrf.mxu0 }
 0x4a1   : > { %v495_v2 = vadd.f32 %v489_v1, %v445_v63 }
 0x4a2   : > { %v977_v3 = vpop.f32.mrf.mxu0 }
 0x4a3   : > { %496 = vst.msk [vmem:[#allocation4 + $0x8] sm:$0xff] %vm219_vm0, %v495_v2 }
 0x4a4   : > { %v492_v6 = vpop.f32.mrf.mxu0 }
 0x4a6   : > { %v978_v7 = vpop.f32.mrf.mxu0 }
 0x4a8   : > { %v624_v9 = vpop.f32.mrf.mxu0 }
 0x4a9   : > { %v630_v10 = vadd.f32 %v624_v9, %v580_v8 }
 0x4aa   : > { %v989_v12 = vpop.f32.mrf.mxu0  ;;  %v782_v23 = vld [vmem:[#allocation4 + $0x8] sm:$0xff] }
 0x4ab   : > { %631 = vst.msk [vmem:[#allocation4 + $0x10] sm:$0xff] %vm219_vm0, %v630_v10 }
 0x4ac   : > { %v627_v17 = vpop.f32.mrf.mxu0 }
 0x4ae   : > { %v990_v18 = vpop.f32.mrf.mxu0 }
 0x4b0   : > { %v759_v20 = vpop.f32.mrf.mxu0 }
 0x4b1   : > { %v765_v21 = vadd.f32 %v759_v20, %v715_v19 }
 0x4b2   : > { %v1001_v13 = vpop.f32.mrf.mxu0  ;;  %v791_v27 = vld [vmem:[#allocation4 + $0x10] sm:$0xff] }
 0x4b3   : > { %766 = vst.msk [vmem:[#allocation4 + $0x18] sm:$0xff] %vm219_vm0, %v765_v21 }
 0x4b4   : > { %v762_v15 = vpop.f32.mrf.mxu0 }
 0x4b6   : > { %v1002_v16 = vpop.f32.mrf.mxu0 }
 0x4ba   : > { %v800_v30 = vld [vmem:[#allocation4 + $0x18] sm:$0xff] }
 0x4f8   : > { %v786_v22 = vpop.permute.xlu1 %785 }
 0x4f9   : > { %v788_v24 = vmul.f32 %v786_v22, %v782_v23 }
 0x4fb   : > { %808 = vrot.lane.b32.xlu0 %v788_v24, %s1103_s27 }
 0x500   : > { %v795_v26 = vpop.permute.xlu0 %794 }
 0x501   : > { %v797_v28 = vmul.f32 %v795_v26, %v791_v27 }
 0x503   : > { %812 = vrot.lane.b32.xlu1 %v797_v28, %s1104_s28 }
 0x508   : > { %v804_v29 = vpop.permute.xlu1 %803 }
 0x509   : > { %v806_v31 = vmul.f32 %v804_v29, %v800_v30 }
 0x50b   : > { %816 = vrot.lane.b32.xlu0 %v806_v31, %s1105_s29 }
 0x56d   : > { %v809_v34 = vpop.permute.xlu0 %808 }
 0x56e   : > { %v819_v36 = vsel %vm219_vm0, %v779_v35, %v809_v34 }
 0x575   : > { %v813_v0 = vpop.permute.xlu1 %812 }
 0x576   : > { %v821_v37 = vsel %vm820_vm4, %v819_v36, %v813_v0 }
 0x57d   : > { %v817_v38 = vpop.permute.xlu0 %816 }
 0x57e   : > { %v823_v39 = vsel %vm822_vm5, %v821_v37, %v817_v38 }
 0x57f   : > { %v824_v40 = vpack.c.bf16 %v823_v39, %v823_v39 }
 0x581   : > { %826 = vst.msk [vmem:[%s204_s4] sm:$0xf] %vm825_vm6, %v824_v40 }
 0x582 PF: > { %s12_s11 = sadd.s32 1, %s1090_s11   ;;  %s1287_s9 = smov %s1086_s10 }
 0x583   : > { %p9_p5 = scmp.ge.s32.totalorder %s12_s11, 4   ;;  %s1288_s10 = smov %s1290_s12 }
 0x585   :  { %11 = sbr.rel (!%p9_p5) target bundleno = 2 (0x2), region = 78 }

// kernel: decoder_layer_forward.18
= control target key start
LH: loop header
LB: loop body
LE: loop exit
PB: predicated region body
PF: predicated region fallthrough
CT: control target
= control target key end

     0   :  { %vm19_vm0 = vcmask 523264   ;;  %v153_v0 = vmov 0.0   ;;  %vm154_vm1 = vmmov 0   ;;  %vm47_vm2 = vcmask 261120   ;;  %s197_s1 = inlined_call_operand.vmem [shape: bf16[32,64], index: 1, kind: input, shape index: {}]   ;;  %s198_s0 = inlined_call_operand.vmem [shape: bf16[16,32], index: 0, kind: input, shape index: {}]   ;;  %s199_s2 = inlined_call_operand.vmem [shape: f32[1,64], index: 2, kind: input, shape index: {}]   ;;  %s200_s3 = inlined_call_operand.vmem [shape: bf16[16,64], index: 3, kind: output, shape index: {}]  }
   0x1   :  { %140 = vmatprep.subr.bf16.mxu0 %v153_v0  ;;  %v150_v1 = vld [vmem:[%s197_s1 + $0x8] sm:$0xff]   ;;  %144 = vmatprep.mubr.msk.bf16.mxu0 %vm154_vm1, %v153_v0  ;;  %20 = vst.msk [vmem:[#allocation2] sm:$0xff] %vm19_vm0, %v153_v0  ;;  %21 = vst.msk [vmem:[#allocation2 + $0x8] sm:$0xff] %vm19_vm0, %v153_v0  ;;  %v151_v2 = vld [vmem:[%s197_s1] sm:$0xff]   ;;  %vm121_vm3 = vcmask 519168  }
   0x2   :  { %141 = vmatpush3.bf16.msra.mxu0 %v150_v1  ;;  %v152_v3 = vld [vmem:[%s198_s0] sm:$0xff]  }
   0x3   :  { %142 = vmatprep.subr.bf16.mxu0 %v153_v0  ;;  %v132_v12 = vld [vmem:[%s199_s2] ss:$0 sm:$0xff] }
   0x6   :  { %143 = vmatpush3.bf16.msra.mxu0 %v151_v2 }
   0x8   :  { %v22_v4 = vld [vmem:[#allocation2] sm:$0xff]  ;;  %v23_v8 = vld [vmem:[#allocation2 + $0x8] sm:$0xff] }
   0x9   :  { %145 = vmatmul.mubr.msk.bf16.vlgmr.msra.gmra.mxu0 %vm47_vm2, %v152_v3 }
  0xc9   :  { %v85_v5 = vpop.f32.mrf.mxu0 }
  0xca   :  { %v92_v6 = vadd.f32 %v85_v5, %v22_v4 }
  0xcb   :  { %v146_v7 = vpop.f32.mrf.mxu0 }
  0xcc   :  { %95 = vst.msk [vmem:[#allocation2] sm:$0xff] %vm19_vm0, %v92_v6 }
  0xcd   :  { %v88_v9 = vpop.f32.mrf.mxu0 }
  0xce   :  { %v93_v10 = vadd.f32 %v88_v9, %v23_v8 }
  0xcf   :  { %v147_v11 = vpop.f32.mrf.mxu0 }
  0xd0   :  { %96 = vst.msk [vmem:[#allocation2 + $0x8] sm:$0xff] %vm19_vm0, %v93_v10 }
  0xd3   :  { %v100_v13 = vld [vmem:[#allocation2] sm:$0xff] }
  0xd4   :  { %v109_v14 = vadd.f32 %v132_v12, %v100_v13 }
  0xd6   :  { %v111_v15 = vmax.f32 %v109_v14, 0.0 }
  0xd7   :  { %v101_v16 = vld [vmem:[#allocation2 + $0x8] sm:$0xff] }
  0xd8   :  { %v135_v17 = vpack.c.bf16 %v111_v15, %v111_v15  ;;  %v110_v18 = vadd.f32 %v132_v12, %v101_v16 }
  0xda   :  { %122 = vst.msk [vmem:[%s200_s3] sm:$0xf] %vm121_vm3, %v135_v17  ;;  %v112_v19 = vmax.f32 %v110_v18, 0.0 }
  0xdc   :  { %v136_v20 = vpack.c.bf16 %v112_v19, %v112_v19 }
  0xde   :  { %123 = vst.msk [vmem:[%s200_s3 + $0x4] sm:$0xf] %vm121_vm3, %v136_v20 }

// kernel: decoder_layer_forward.19
= control target key start
LH: loop header
LB: loop body
LE: loop exit
PB: predicated region body
PF: predicated region fallthrough
CT: control target
= control target key end

     0   :  { %vm28_vm0 = vcmask 261120   ;;  %v234_v0 = vmov 0.0   ;;  %vm235_vm1 = vmmov 0   ;;  %vm72_vm2 = vcmask 523264   ;;  %s314_s1 = inlined_call_operand.vmem [shape: bf16[64,32], index: 1, kind: input, shape index: {}]   ;;  %s315_s0 = inlined_call_operand.vmem [shape: bf16[16,64], index: 0, kind: input, shape index: {}]   ;;  %s316_s3 = inlined_call_operand.vmem [shape: bf16[16,32], index: 3, kind: input, shape index: {}]   ;;  %s317_s2 = inlined_call_operand.vmem [shape: f32[1,32], index: 2, kind: input, shape index: {}]   ;;  %s318_s4 = inlined_call_operand.vmem [shape: f32[1,32], index: 4, kind: input, shape index: {}]   ;;  %s319_s5 = inlined_call_operand.vmem [shape: f32[1,32], index: 5, kind: input, shape index: {}]   ;;  %s320_s6 = inlined_call_operand.vmem [shape: f32[16,32], index: 6, kind: output, shape index: {}]  }
   0x1   :  { %211 = vmatprep.subr.bf16.mxu0 %v234_v0  ;;  %v225_v1 = vld [vmem:[%s314_s1 + $0x18] sm:$0xff]   ;;  %219 = vmatprep.mubr.msk.bf16.mxu0 %vm235_vm1, %v234_v0  ;;  %29 = vst.msk [vmem:[#allocation2] sm:$0xff] %vm28_vm0, %v234_v0  ;;  %30 = vst.msk [vmem:[#allocation2 + $0x8] sm:$0xff] %vm28_vm0, %v234_v0  ;;  %v226_v2 = vld [vmem:[%s314_s1 + $0x10] sm:$0xff]  }
   0x2   :  { %212 = vmatpush3.bf16.msra.mxu0 %v225_v1  ;;  %v227_v3 = vld [vmem:[%s314_s1 + $0x8] sm:$0xff]   ;;  %v228_v4 = vld [vmem:[%s314_s1] sm:$0xff]  }
   0x3   :  { %213 = vmatprep.subr.bf16.mxu0 %v234_v0  ;;  %v229_v5 = vld [vmem:[%s315_s0] sm:$0xff]  }
   0x4   :  { %v203_v14 = vld [vmem:[%s316_s3] sm:$0xff]  }
   0x5   :  { %v199_v15 = vld [vmem:[%s317_s2] ss:$0 sm:$0xff]  ;;  %v204_v16 = vunpack.c.l.bf16 %v203_v14  ;;  %v205_v20 = vunpack.c.h.bf16 %v203_v14 }
   0x6   :  { %214 = vmatpush3.bf16.msra.mxu0 %v226_v2  ;;  %v200_v43 = vld [vmem:[%s318_s4] ss:$0 sm:$0xff] }
   0x7   :  { %215 = vmatprep.subr.bf16.mxu0 %v234_v0  ;;  %v201_v45 = vld [vmem:[%s319_s5] ss:$0 sm:$0xff] }
   0x8   :  { %v31_v6 = vld [vmem:[#allocation2] sm:$0xff]  ;;  %v32_v10 = vld [vmem:[#allocation2 + $0x8] sm:$0xff] }
   0xa   :  { %216 = vmatpush3.bf16.msra.mxu0 %v227_v3 }
   0xb   :  { %217 = vmatprep.subr.bf16.mxu0 %v234_v0 }
   0xe   :  { %218 = vmatpush3.bf16.msra.mxu0 %v228_v4 }
  0x11   :  { %220 = vmatmul.mubr.msk.bf16.vlgmr.msra.gmra.mxu0 %vm72_vm2, %v229_v5 }
  0xd1   :  { %v110_v7 = vpop.f32.mrf.mxu0 }
  0xd2   :  { %v117_v8 = vadd.f32 %v110_v7, %v31_v6 }
  0xd3   :  { %v221_v9 = vpop.f32.mrf.mxu0 }
  0xd4   :  { %120 = vst.msk [vmem:[#allocation2] sm:$0xff] %vm28_vm0, %v117_v8 }
  0xd5   :  { %v113_v11 = vpop.f32.mrf.mxu0 }
  0xd6   :  { %v118_v12 = vadd.f32 %v113_v11, %v32_v10 }
  0xd7   :  { %v222_v13 = vpop.f32.mrf.mxu0 }
  0xd8   :  { %121 = vst.msk [vmem:[#allocation2 + $0x8] sm:$0xff] %vm28_vm0, %v118_v12 }
  0xdb   :  { %v125_v17 = vld [vmem:[#allocation2] sm:$0xff] }
  0xdc   :  { %v134_v18 = vadd.f32 %v199_v15, %v125_v17 }
  0xde   :  { %v140_v19 = vadd.f32 %v204_v16, %v134_v18 }
  0xdf   :  { %v126_v21 = vld [vmem:[#allocation2 + $0x8] sm:$0xff] }
  0xe0   :  { %v142_v22 = vsel %vm28_vm0, %v140_v19, 0.0  ;;  %v135_v23 = vadd.f32 %v199_v15, %v126_v21 }
  0xe1   :  { %143 = vadd.xlane.f32.xlu0 %v142_v22 }
  0xe2   :  { %v141_v24 = vadd.f32 %v205_v20, %v135_v23 }
  0xe4   :  { %v145_v25 = vsel %vm28_vm0, %v141_v24, 0.0 }
  0xe5   :  { %146 = vadd.xlane.f32.xlu0 %v145_v25 }
 0x16a   :  { %v144_v26 = vpop.xlane.xlu0 %143 }
 0x16b   :  { %v149_v27 = vmul.f32 0.03125, %v144_v26 }
 0x16d   :  { %v151_v28 = vsub.f32 %v140_v19, %v149_v27 }
 0x16e   :  { %v147_v29 = vpop.xlane.xlu0 %146 }
 0x16f   :  { %v150_v30 = vmul.f32 0.03125, %v147_v29  ;;  %v153_v31 = vmul.f32 %v151_v28, %v151_v28 }
 0x171   :  { %v152_v32 = vsub.f32 %v141_v24, %v150_v30  ;;  %v155_v33 = vsel %vm28_vm0, %v153_v31, 0.0 }
 0x172   :  { %156 = vadd.xlane.f32.xlu1 %v155_v33 }
 0x173   :  { %v154_v34 = vmul.f32 %v152_v32, %v152_v32 }
 0x175   :  { %v158_v35 = vsel %vm28_vm0, %v154_v34, 0.0 }
 0x176   :  { %159 = vadd.xlane.f32.xlu1 %v158_v35 }
 0x1fb   :  { %v157_v36 = vpop.xlane.xlu1 %156 }
 0x1fc   :  { %v161_v37 = vmul.f32 0.03125, %v157_v36 }
 0x1fe   :  { %v163_v38 = vadd.f32 1e-05, %v161_v37 }
 0x1ff   :  { %v160_v39 = vpop.xlane.xlu1 %159 }
 0x200   :  { %230 = vrsqrt.f32 %v163_v38  ;;  %v162_v40 = vmul.f32 0.03125, %v160_v39 }
 0x202   :  { %v164_v41 = vadd.f32 1e-05, %v162_v40 }
 0x204   :  { %232 = vrsqrt.f32 %v164_v41 }
 0x20d   :  { %v231_v42 = vpop.eup %230 }
 0x20e   :  { %v167_v44 = vmul.f32 %v231_v42, %v151_v28 }
 0x210   :  { %v176_v46 = vmul.f32 %v200_v43, %v167_v44 }
 0x211   :  { %v233_v47 = vpop.eup %232 }
 0x212   :  { %v185_v48 = vadd.f32 %v201_v45, %v176_v46  ;;  %v168_v49 = vmul.f32 %v233_v47, %v152_v32 }
 0x214   :  { %187 = vst.msk [vmem:[%s320_s6] sm:$0xff] %vm28_vm0, %v185_v48  ;;  %v177_v50 = vmul.f32 %v200_v43, %v168_v49 }
 0x216   :  { %v186_v51 = vadd.f32 %v201_v45, %v177_v50 }
 0x218   :  { %188 = vst.msk [vmem:[%s320_s6 + $0x8] sm:$0xff] %vm28_vm0, %v186_v51 }

</bundles_post_ra>
